<compile_context>
chip_gen: v7x
topology: tpu7x:2x2x1
jax: 0.10.0
libtpu: 0.0.40
codegen_flags: <defaults>
</compile_context>

<pallas_src>
import jax
import jax.numpy as jnp
from jax.experimental import pallas as pl
from jax.experimental.pallas import tpu as pltpu


# ---------------------------------------------------------------------------
# helpers
# ---------------------------------------------------------------------------
def _pick_tile(n, target, align=8):
    """Largest divisor of n that is <= target and a multiple of `align`
    (falls back to the full extent, which always satisfies the TPU tiling rule)."""
    if n <= target:
        return n
    for t in range(target, 0, -1):
        if n % t == 0 and t % align == 0:
            return t
    return n


def _gelu_tanh(x):
    # tanh approximation of GELU (PyTorch F.gelu uses exact erf; the tanh form is
    # used here so only EUP-native ops are required).  Same formula is used in the
    # pure-JAX reference below.
    c0 = 0.7978845608028654  # sqrt(2/pi)
    return 0.5 * x * (1.0 + jnp.tanh(c0 * (x + 0.044715 * x * x * x)))


# ---------------------------------------------------------------------------
# Kernel 1: fused LayerNorm (over channels) + 1x1 conv (matmul over channels)
# ---------------------------------------------------------------------------
def _make_norm_pw_kernel(bias_free):
    def kernel(x_ref, lnw_ref, lnb_ref, w_ref, o_ref):
        x = x_ref[0].astype(jnp.float32)                       # (T, Cin)
        mu = jnp.mean(x, axis=-1, keepdims=True)
        var = jnp.mean(jnp.square(x - mu), axis=-1, keepdims=True)
        inv = jax.lax.rsqrt(var + 1e-5)
        lnw = lnw_ref[0].astype(jnp.float32)
        if bias_free:
            y = x * inv * lnw
        else:
            y = (x - mu) * inv * lnw + lnb_ref[0].astype(jnp.float32)
        o_ref[0] = jnp.dot(y, w_ref[...].astype(jnp.float32),
                           preferred_element_type=jnp.float32).astype(o_ref.dtype)
    return kernel


def norm_pointwise(x, ln_w, ln_b, w_t, bias_free=False, *, tile_target=512):
    # x: (B, HW, Cin);  w_t: (Cin, Cout);  LayerNorm over the channel axis.
    B, HW, Cin = x.shape
    Cout = w_t.shape[1]
    T = _pick_tile(HW, tile_target)
    return pl.pallas_call(
        _make_norm_pw_kernel(bias_free),
        out_shape=jax.ShapeDtypeStruct((B, HW, Cout), x.dtype),
        grid=(B, HW // T),
        in_specs=[
            pl.BlockSpec((1, T, Cin), lambda b, t: (b, t, 0)),
            pl.BlockSpec((1, Cin), lambda b, t: (0, 0)),
            pl.BlockSpec((1, Cin), lambda b, t: (0, 0)),
            pl.BlockSpec((Cin, Cout), lambda b, t: (0, 0)),
        ],
        out_specs=pl.BlockSpec((1, T, Cout), lambda b, t: (b, t, 0)),
        compiler_params=pltpu.CompilerParams(
            dimension_semantics=("parallel", "parallel")),
    )(x, ln_w.reshape(1, Cin), ln_b.reshape(1, Cin), w_t)


# ---------------------------------------------------------------------------
# Kernel 2: 3x3 depthwise conv (padding=1), channels-last, H-tiled with
#           in-kernel halo handling.  Writes two channel splits directly.
# ---------------------------------------------------------------------------
def _make_dwconv_kernel(split):
    def kernel(xc_ref, xt_ref, xb_ref, w_ref, o1_ref, o2_ref):
        i = pl.program_id(1)
        ni = pl.num_programs(1)
        th, W, Cm = xc_ref.shape[1], xc_ref.shape[2], xc_ref.shape[3]

        center = xc_ref[0].astype(jnp.float32)                 # (th, W, Cm)
        top = xt_ref[0].astype(jnp.float32) * jnp.where(i == 0, 0.0, 1.0)
        bot = xb_ref[0].astype(jnp.float32) * jnp.where(i == ni - 1, 0.0, 1.0)

        slab = jnp.concatenate([top, center, bot], axis=0)     # (th+2, W, Cm)
        zcol = jnp.zeros((th + 2, 1, Cm), jnp.float32)
        slab = jnp.concatenate([zcol, slab, zcol], axis=1)     # (th+2, W+2, Cm)

        w = w_ref[...].astype(jnp.float32)                     # (3, 3, Cm)
        acc = jnp.zeros((th, W, Cm), jnp.float32)
        for dy in range(3):
            for dx in range(3):
                acc = acc + slab[dy:dy + th, dx:dx + W, :] * w[dy, dx]

        o1_ref[0] = acc[:, :, :split].astype(o1_ref.dtype)
        o2_ref[0] = acc[:, :, split:].astype(o2_ref.dtype)
    return kernel


def dwconv3x3_split(x_nhwc, w33c, split, *, tile_h_target=8):
    # x_nhwc: (B, H, W, Cm);  w33c: (3, 3, Cm);  returns channels [:split], [split:]
    B, H, W, Cm = x_nhwc.shape
    TH = _pick_tile(H, tile_h_target, align=1)
    return pl.pallas_call(
        _make_dwconv_kernel(split),
        out_shape=(jax.ShapeDtypeStruct((B, H, W, split), x_nhwc.dtype),
                   jax.ShapeDtypeStruct((B, H, W, Cm - split), x_nhwc.dtype)),
        grid=(B, H // TH),
        in_specs=[
            pl.BlockSpec((1, TH, W, Cm), lambda b, i: (b, i, 0, 0)),
            # halo rows: block size 1 along H => block index == element row index
            pl.BlockSpec((1, 1, W, Cm),
                         lambda b, i: (b, jnp.maximum(i * TH - 1, 0), 0, 0)),
            pl.BlockSpec((1, 1, W, Cm),
                         lambda b, i: (b, jnp.minimum((i + 1) * TH, H - 1), 0, 0)),
            pl.BlockSpec((3, 3, Cm), lambda b, i: (0, 0, 0)),
        ],
        out_specs=(pl.BlockSpec((1, TH, W, split), lambda b, i: (b, i, 0, 0)),
                   pl.BlockSpec((1, TH, W, Cm - split), lambda b, i: (b, i, 0, 0))),
        compiler_params=pltpu.CompilerParams(
            dimension_semantics=("parallel", "parallel")),
    )(x_nhwc, x_nhwc, x_nhwc, w33c)


# ---------------------------------------------------------------------------
# Kernel 3: MDTA gram kernel — streams HW chunks, accumulates per-head
#           k^T q Gram + per-channel sum-of-squares, finalizes L2-normalization,
#           temperature scale and softmax (over the k-channel axis).
#           Output A[b, h, ck, cq] = softmax_ck(kn^T qn * temp).
# ---------------------------------------------------------------------------
def _make_gram_kernel(num_heads, CH, C):
    def kernel(temp_ref, qk_ref, a_ref, ssq_q_ref, ssq_k_ref):
        c = pl.program_id(1)
        nc = pl.num_programs(1)

        @pl.when(c == 0)
        def _():
            a_ref[...] = jnp.zeros_like(a_ref)
            ssq_q_ref[...] = jnp.zeros_like(ssq_q_ref)
            ssq_k_ref[...] = jnp.zeros_like(ssq_k_ref)

        slab = qk_ref[0].astype(jnp.float32)                   # (T, 2C) = [q | k]
        T = slab.shape[0]
        q_all = slab[:, :C]
        ssq_q_ref[...] = ssq_q_ref[...] + jnp.sum(q_all * q_all, axis=0,
                                                  keepdims=True)          # (1, C)
        ones_col = jnp.ones((T, 1), jnp.float32)
        for h in range(num_heads):
            q_h = slab[:, h * CH:(h + 1) * CH]                 # (T, CH)
            k_h = slab[:, C + h * CH:C + (h + 1) * CH]         # (T, CH)
            # raw Gram: G[ck, cq] = sum_hw k[hw, ck] * q[hw, cq]
            a_ref[0, h] = a_ref[0, h] + jax.lax.dot_general(
                k_h, q_h, (((0,), (0,)), ((), ())),
                preferred_element_type=jnp.float32)
            # per-channel ||k||^2 as a column vector (CH, 1) via matmul with ones
            ssq_k_ref[h] = ssq_k_ref[h] + jax.lax.dot_general(
                k_h * k_h, ones_col, (((0,), (0,)), ((), ())),
                preferred_element_type=jnp.float32)

        @pl.when(c == nc - 1)
        def _():
            eps = 1e-12  # matches torch.nn.functional.normalize default
            ssq_q = ssq_q_ref[...]                             # (1, C)
            for h in range(num_heads):
                inv_q = 1.0 / jnp.maximum(
                    jnp.sqrt(ssq_q[:, h * CH:(h + 1) * CH]), eps)   # (1, CH) -> cq
                inv_k = 1.0 / jnp.maximum(jnp.sqrt(ssq_k_ref[h]), eps)  # (CH,1) -> ck
                a = a_ref[0, h] * inv_k * inv_q * temp_ref[h]
                a = a - jnp.max(a, axis=0, keepdims=True)      # softmax over ck
                a = jnp.exp(a)
                a = a / jnp.sum(a, axis=0, keepdims=True)
                a_ref[0, h] = a
    return kernel


def mdta_gram(qk, temperature, num_heads, *, tile_target=512):
    # qk: (B, HW, 2C) channels-last ([q | k]);  returns A: (B, NH, CH, CH) f32
    B, HW, C2 = qk.shape
    C = C2 // 2
    CH = C // num_heads
    T = _pick_tile(HW, tile_target)
    return pl.pallas_call(
        _make_gram_kernel(num_heads, CH, C),
        out_shape=jax.ShapeDtypeStruct((B, num_heads, CH, CH), jnp.float32),
        grid=(B, HW // T),
        in_specs=[
            pl.BlockSpec(memory_space=pltpu.MemorySpace.SMEM),   # temperature
            pl.BlockSpec((1, T, C2), lambda b, c: (b, c, 0)),
        ],
        out_specs=pl.BlockSpec((1, num_heads, CH, CH), lambda b, c: (b, 0, 0, 0)),
        scratch_shapes=[pltpu.VMEM((1, C), jnp.float32),
                        pltpu.VMEM((num_heads, CH, 1), jnp.float32)],
        compiler_params=pltpu.CompilerParams(
            dimension_semantics=("parallel", "arbitrary")),
    )(temperature, qk)


# ---------------------------------------------------------------------------
# Kernel 4: attention apply + project_out + residual (streams v over HW tiles)
# ---------------------------------------------------------------------------
def _make_apply_kernel(num_heads, CH):
    def kernel(v_ref, a_ref, w_ref, res_ref, o_ref):
        v = v_ref[0].astype(jnp.float32)                       # (T, C)
        outs = []
        for h in range(num_heads):
            v_h = v[:, h * CH:(h + 1) * CH]                    # (T, CH)
            outs.append(jnp.dot(v_h, a_ref[0, h],
                                preferred_element_type=jnp.float32))
        attn_out = jnp.concatenate(outs, axis=1)               # (T, C)
        proj = jnp.dot(attn_out, w_ref[...].astype(jnp.float32),
                       preferred_element_type=jnp.float32)
        o_ref[0] = (res_ref[0].astype(jnp.float32) + proj).astype(o_ref.dtype)
    return kernel


def attn_apply_proj_residual(v, a, proj_w_t, residual, num_heads, *, tile_target=512):
    B, HW, C = v.shape
    CH = C // num_heads
    T = _pick_tile(HW, tile_target)
    return pl.pallas_call(
        _make_apply_kernel(num_heads, CH),
        out_shape=jax.ShapeDtypeStruct((B, HW, C), residual.dtype),
        grid=(B, HW // T),
        in_specs=[
            pl.BlockSpec((1, T, C), lambda b, t: (b, t, 0)),
            pl.BlockSpec((1, num_heads, CH, CH), lambda b, t: (b, 0, 0, 0)),
            pl.BlockSpec((C, C), lambda b, t: (0, 0)),
            pl.BlockSpec((1, T, C), lambda b, t: (b, t, 0)),
        ],
        out_specs=pl.BlockSpec((1, T, C), lambda b, t: (b, t, 0)),
        compiler_params=pltpu.CompilerParams(
            dimension_semantics=("parallel", "parallel")),
    )(v, a, proj_w_t, residual)


# ---------------------------------------------------------------------------
# Kernel 5: FFN tail — gelu(x1) * x2, project_out, residual
# ---------------------------------------------------------------------------
def _ffn_tail_kernel(x1_ref, x2_ref, w_ref, res_ref, o_ref):
    x1 = x1_ref[0].astype(jnp.float32)
    x2 = x2_ref[0].astype(jnp.float32)
    y = _gelu_tanh(x1) * x2
    proj = jnp.dot(y, w_ref[...].astype(jnp.float32),
                   preferred_element_type=jnp.float32)
    o_ref[0] = (res_ref[0].astype(jnp.float32) + proj).astype(o_ref.dtype)


def ffn_gate_proj_residual(x1, x2, w_t, residual, *, tile_target=512):
    B, HW, Hd = x1.shape
    C = w_t.shape[1]
    T = _pick_tile(HW, tile_target)
    return pl.pallas_call(
        _ffn_tail_kernel,
        out_shape=jax.ShapeDtypeStruct((B, HW, C), residual.dtype),
        grid=(B, HW // T),
        in_specs=[
            pl.BlockSpec((1, T, Hd), lambda b, t: (b, t, 0)),
            pl.BlockSpec((1, T, Hd), lambda b, t: (b, t, 0)),
            pl.BlockSpec((Hd, C), lambda b, t: (0, 0)),
            pl.BlockSpec((1, T, C), lambda b, t: (b, t, 0)),
        ],
        out_specs=pl.BlockSpec((1, T, C), lambda b, t: (b, t, 0)),
        compiler_params=pltpu.CompilerParams(
            dimension_semantics=("parallel", "parallel")),
    )(x1, x2, w_t, residual)


# ---------------------------------------------------------------------------
# Full TransformerBlock forward (host glue = one transpose in, one out, reshapes)
# ---------------------------------------------------------------------------
def transformer_block_forward(x_nchw, params, num_heads, layernorm_type="WithBias"):
    B, C, H, W = x_nchw.shape
    HW = H * W
    hidden = params["pout_w"].shape[1]
    bias_free = (layernorm_type == "BiasFree")

    x = jnp.transpose(x_nchw, (0, 2, 3, 1)).reshape(B, HW, C)       # channels-last

    # ---------------- attention branch ----------------
    qkv = norm_pointwise(x, params["norm1_w"], params["norm1_b"],
                         jnp.transpose(params["qkv_w"]), bias_free)  # (B, HW, 3C)
    dw1 = jnp.transpose(params["dw1_w"], (1, 2, 0))                  # (3, 3, 3C)
    qk, v = dwconv3x3_split(qkv.reshape(B, H, W, 3 * C), dw1, split=2 * C)
    qk = qk.reshape(B, HW, 2 * C)
    v = v.reshape(B, HW, C)
    a = mdta_gram(qk, params["temperature"], num_heads)              # (B, NH, CH, CH)
    y1 = attn_apply_proj_residual(v, a, jnp.transpose(params["proj_w"]),
                                  x, num_heads)                      # (B, HW, C)

    # ---------------- FFN branch ----------------
    pin = norm_pointwise(y1, params["norm2_w"], params["norm2_b"],
                         jnp.transpose(params["pin_w"]), bias_free)  # (B, HW, 2*hid)
    dw2 = jnp.transpose(params["dw2_w"], (1, 2, 0))                  # (3, 3, 2*hid)
    x1, x2 = dwconv3x3_split(pin.reshape(B, H, W, 2 * hidden), dw2, split=hidden)
    x1 = x1.reshape(B, HW, hidden)
    x2 = x2.reshape(B, HW, hidden)
    y2 = ffn_gate_proj_residual(x1, x2, jnp.transpose(params["pout_w"]), y1)

    return jnp.transpose(y2.reshape(B, H, W, C), (0, 3, 1, 2))


# ---------------------------------------------------------------------------
# Pure-JAX reference (mirrors the PyTorch module; bias=False convs)
# ---------------------------------------------------------------------------
def reference_forward(x, params, num_heads, bias_free=False):
    B, C, H, W = x.shape

    def layer_norm(t, w, b):
        tm = jnp.transpose(t, (0, 2, 3, 1))
        mu = jnp.mean(tm, axis=-1, keepdims=True)
        var = jnp.mean(jnp.square(tm - mu), axis=-1, keepdims=True)
        inv = jax.lax.rsqrt(var + 1e-5)
        y = tm * inv * w if bias_free else (tm - mu) * inv * w + b
        return jnp.transpose(y, (0, 3, 1, 2))

    def conv1x1(t, w):
        return jnp.einsum("bchw,oc->bohw", t, w)

    def dwconv(t, w):
        xp = jnp.pad(t, ((0, 0), (0, 0), (1, 1), (1, 1)))
        out = jnp.zeros_like(t)
        for dy in range(3):
            for dx in range(3):
                out = out + xp[:, :, dy:dy + H, dx:dx + W] * w[None, :, dy, dx, None, None]
        return out

    # attention
    xn = layer_norm(x, params["norm1_w"], params["norm1_b"])
    qkv = dwconv(conv1x1(xn, params["qkv_w"]), params["dw1_w"])
    q, k, v = jnp.split(qkv, 3, axis=1)
    CH = C // num_heads

    def rr(t):
        return t.reshape(B, num_heads, CH, H * W)

    def l2n(t):
        return t / jnp.maximum(jnp.linalg.norm(t, axis=-1, keepdims=True), 1e-12)

    qn, kn, vh = l2n(rr(q)), l2n(rr(k)), rr(v)
    attn = jnp.einsum("bhcd,bhed->bhce", qn, kn) * params["temperature"][None, :, None, None]
    attn = jax.nn.softmax(attn, axis=-1)
    o = jnp.einsum("bhce,bhed->bhcd", attn, vh).reshape(B, C, H, W)
    y1 = x + conv1x1(o, params["proj_w"])

    # ffn
    yn = layer_norm(y1, params["norm2_w"], params["norm2_b"])
    pin = dwconv(conv1x1(yn, params["pin_w"]), params["dw2_w"])
    x1, x2 = jnp.split(pin, 2, axis=1)
    g = _gelu_tanh(x1) * x2
    y2 = y1 + conv1x1(g, params["pout_w"])
    return y2


if __name__ == "__main__":
    B, C, H, W = 2, 8, 32, 32
    num_heads = 2
    ffn_expansion_factor = 2
    hidden = int(C * ffn_expansion_factor)

    keys = jax.random.split(jax.random.PRNGKey(0), 12)
    params = {
        # LayerNorm(dim) weights / biases
        "norm1_w": 1.0 + 0.1 * jax.random.normal(keys[0], (C,), jnp.float32),
        "norm1_b": 0.1 * jax.random.normal(keys[1], (C,), jnp.float32),
        "norm2_w": 1.0 + 0.1 * jax.random.normal(keys[2], (C,), jnp.float32),
        "norm2_b": 0.1 * jax.random.normal(keys[3], (C,), jnp.float32),
        # Attention: Conv2d(C, 3C, 1) -> (3C, C); depthwise (3C,1,3,3) -> (3C,3,3);
        # project_out Conv2d(C, C, 1) -> (C, C);  temperature (num_heads,)
        "qkv_w": 0.1 * jax.random.normal(keys[4], (3 * C, C), jnp.float32),
        "dw1_w": 0.1 * jax.random.normal(keys[5], (3 * C, 3, 3), jnp.float32),
        "proj_w": 0.1 * jax.random.normal(keys[6], (C, C), jnp.float32),
        "temperature": 1.0 + 0.1 * jax.random.normal(keys[7], (num_heads,), jnp.float32),
        # FeedForward: project_in Conv2d(C, 2*hid, 1) -> (2*hid, C);
        # depthwise (2*hid,1,3,3) -> (2*hid,3,3);  project_out Conv2d(hid, C, 1) -> (C, hid)
        "pin_w": 0.1 * jax.random.normal(keys[8], (2 * hidden, C), jnp.float32),
        "dw2_w": 0.1 * jax.random.normal(keys[9], (2 * hidden, 3, 3), jnp.float32),
        "pout_w": 0.1 * jax.random.normal(keys[10], (C, hidden), jnp.float32),
    }
    x = jax.random.normal(keys[11], (B, C, H, W), jnp.float32)

    out = transformer_block_forward(x, params, num_heads, layernorm_type="WithBias")
    out = jax.block_until_ready(out)

    ref = reference_forward(x, params, num_heads, bias_free=False)
    assert out.shape == (B, C, H, W)
    max_err = float(jnp.abs(out - ref).max())
    assert jnp.allclose(out, ref, atol=1e-3, rtol=1e-3), max_err

    print("KERNEL_OK")
</pallas_src>

<mosaic_0001>
module attributes {stable_mosaic.version = 11 : i64} {
  func.func @kernel(%arg0: i32, %arg1: i32, %arg2: memref<1x512x8xf32, #tpu.memory_space<vmem>>, %arg3: memref<1x8xf32, #tpu.memory_space<vmem>>, %arg4: memref<1x8xf32, #tpu.memory_space<vmem>>, %arg5: memref<8x24xf32, #tpu.memory_space<vmem>>, %arg6: memref<1x512x24xf32, #tpu.memory_space<vmem>>) attributes {dimension_semantics = [#tpu.dimension_semantics<parallel>, #tpu.dimension_semantics<parallel>], iteration_bounds = array<i64: 2, 2>, scalar_prefetch = 0 : i64, scratch_operands = 0 : i64, tpu.core_type = #tpu.core_type<tc>, window_params = [{transform_indices = @transform_0, window_bounds = array<i64: 1, 512, 8>}, {pipeline_mode = #tpu.pipeline_mode<synchronous>, transform_indices = @transform_1, window_bounds = array<i64: 1, 8>}, {pipeline_mode = #tpu.pipeline_mode<synchronous>, transform_indices = @transform_2, window_bounds = array<i64: 1, 8>}, {pipeline_mode = #tpu.pipeline_mode<synchronous>, transform_indices = @transform_3, window_bounds = array<i64: 8, 24>}, {transform_indices = @transform_4, window_bounds = array<i64: 1, 512, 24>}]} {
    %c0 = arith.constant 0 : index
    %c0_0 = arith.constant 0 : index
    %c0_1 = arith.constant 0 : index
    %0 = vector.load %arg2[%c0, %c0_0, %c0_1] : memref<1x512x8xf32, #tpu.memory_space<vmem>>, vector<1x512x8xf32>
    %1 = vector.shape_cast %0 : vector<1x512x8xf32> to vector<512x8xf32>
    %cst = arith.constant dense<0.000000e+00> : vector<512xf32>
    %2 = vector.multi_reduction <add>, %1, %cst [1] : vector<512x8xf32> to vector<512xf32>
    %3 = vector.shape_cast %2 : vector<512xf32> to vector<512x1xf32>
    %cst_2 = arith.constant 8.000000e+00 : f32
    %4 = vector.broadcast %cst_2 : f32 to vector<512x1xf32>
    %5 = arith.divf %3, %4 : vector<512x1xf32>
    %6 = vector.broadcast %5 : vector<512x1xf32> to vector<512x8xf32>
    %7 = arith.subf %1, %6 : vector<512x8xf32>
    %8 = arith.mulf %7, %7 : vector<512x8xf32>
    %cst_3 = arith.constant dense<0.000000e+00> : vector<512xf32>
    %9 = vector.multi_reduction <add>, %8, %cst_3 [1] : vector<512x8xf32> to vector<512xf32>
    %10 = vector.shape_cast %9 : vector<512xf32> to vector<512x1xf32>
    %cst_4 = arith.constant 8.000000e+00 : f32
    %11 = vector.broadcast %cst_4 : f32 to vector<512x1xf32>
    %12 = arith.divf %10, %11 : vector<512x1xf32>
    %cst_5 = arith.constant 9.99999974E-6 : f32
    %13 = vector.broadcast %cst_5 : f32 to vector<512x1xf32>
    %14 = arith.addf %12, %13 : vector<512x1xf32>
    %15 = math.rsqrt %14 : vector<512x1xf32>
    %c0_6 = arith.constant 0 : index
    %c0_7 = arith.constant 0 : index
    %16 = vector.load %arg3[%c0_6, %c0_7] : memref<1x8xf32, #tpu.memory_space<vmem>>, vector<1x8xf32>
    %17 = vector.shape_cast %16 : vector<1x8xf32> to vector<8xf32>
    %18 = vector.broadcast %5 : vector<512x1xf32> to vector<512x8xf32>
    %19 = arith.subf %1, %18 : vector<512x8xf32>
    %20 = vector.broadcast %15 : vector<512x1xf32> to vector<512x8xf32>
    %21 = arith.mulf %19, %20 : vector<512x8xf32>
    %22 = vector.shape_cast %17 : vector<8xf32> to vector<1x8xf32>
    %23 = vector.broadcast %22 : vector<1x8xf32> to vector<512x8xf32>
    %24 = arith.mulf %21, %23 : vector<512x8xf32>
    %c0_8 = arith.constant 0 : index
    %c0_9 = arith.constant 0 : index
    %25 = vector.load %arg4[%c0_8, %c0_9] : memref<1x8xf32, #tpu.memory_space<vmem>>, vector<1x8xf32>
    %26 = vector.shape_cast %25 : vector<1x8xf32> to vector<8xf32>
    %27 = vector.shape_cast %26 : vector<8xf32> to vector<1x8xf32>
    %28 = vector.broadcast %27 : vector<1x8xf32> to vector<512x8xf32>
    %29 = arith.addf %24, %28 : vector<512x8xf32>
    %c0_10 = arith.constant 0 : index
    %c0_11 = arith.constant 0 : index
    %30 = vector.load %arg5[%c0_10, %c0_11] : memref<8x24xf32, #tpu.memory_space<vmem>>, vector<8x24xf32>
    %cst_12 = arith.constant dense<0.000000e+00> : vector<512x24xf32>
    %31 = tpu.matmul %29, %30, %cst_12 {dimension_numbers = #tpu.dot_dimension_numbers<[1], [0], [0], [1], [0, 0, 1, 1], [], []>} : vector<512x8xf32>, vector<8x24xf32>, vector<512x24xf32> -> vector<512x24xf32>
    %c0_13 = arith.constant 0 : index
    %c0_14 = arith.constant 0 : index
    %c0_15 = arith.constant 0 : index
    %32 = vector.load %arg6[%c0_13, %c0_14, %c0_15] : memref<1x512x24xf32, #tpu.memory_space<vmem>>, vector<1x512x24xf32>
    %33 = vector.shape_cast %32 : vector<1x512x24xf32> to vector<512x24xf32>
    %34 = vector.shape_cast %31 : vector<512x24xf32> to vector<1x512x24xf32>
    tpu.vector_store %arg6[%c0_13, %c0_14, %c0_15], %34 {strides = array<i32>} : memref<1x512x24xf32, #tpu.memory_space<vmem>>, vector<1x512x24xf32>,
    return
  }
  func.func @transform_0(%arg0: i32, %arg1: i32) -> (i32, i32, i32) {
    %c0_i32 = arith.constant 0 : i32
    %c0_i32_0 = arith.constant 0 : i32
    return %arg0, %arg1, %c0_i32 : i32, i32, i32
  }
  func.func @transform_1(%arg0: i32, %arg1: i32) -> (i32, i32) {
    %c0_i32 = arith.constant 0 : i32
    %c0_i32_0 = arith.constant 0 : i32
    %c0_i32_1 = arith.constant 0 : i32
    return %c0_i32, %c0_i32_0 : i32, i32
  }
  func.func @transform_2(%arg0: i32, %arg1: i32) -> (i32, i32) {
    %c0_i32 = arith.constant 0 : i32
    %c0_i32_0 = arith.constant 0 : i32
    %c0_i32_1 = arith.constant 0 : i32
    return %c0_i32, %c0_i32_0 : i32, i32
  }
  func.func @transform_3(%arg0: i32, %arg1: i32) -> (i32, i32) {
    %c0_i32 = arith.constant 0 : i32
    %c0_i32_0 = arith.constant 0 : i32
    %c0_i32_1 = arith.constant 0 : i32
    return %c0_i32, %c0_i32_0 : i32, i32
  }
  func.func @transform_4(%arg0: i32, %arg1: i32) -> (i32, i32, i32) {
    %c0_i32 = arith.constant 0 : i32
    %c0_i32_0 = arith.constant 0 : i32
    return %arg0, %arg1, %c0_i32 : i32, i32, i32
  }
}

</mosaic_0001>

<bundles_post_ra>
// kernel: tpu_custom_call.1
= control target key start
LH: loop header
LB: loop body
LE: loop exit
PB: predicated region body
PF: predicated region fallthrough
CT: control target
= control target key end

     0   :  { %s2489_s15 = smov 0   ;;  %s2491_s16 = smov 0   ;;  %s3644_s0 = inlined_call_operand.vmem [shape: f32[2,1024,8], index: 0, kind: input, shape index: {}]   ;;  %s3645_s1 = inlined_call_operand.vmem [shape: f32[1,8], index: 1, kind: input, shape index: {}]   ;;  %s3646_s2 = inlined_call_operand.vmem [shape: f32[1,8], index: 2, kind: input, shape index: {}]   ;;  %s3647_s3 = inlined_call_operand.vmem [shape: f32[8,24], index: 3, kind: input, shape index: {}]   ;;  %s3648_s4 = inlined_call_operand.vmem [shape: f32[2,1024,24], index: 4, kind: output, shape index: {}]  }
   0x1   :  { %s2493_s17 = smov 0   ;;  %s2495_s18 = smov 0  }
   0x2   :  { %s2497_s19 = smov 0  }
   0x3 LB: > { %s23_s20 = sadd.s32 1, %s2454_s17  ;;  %s26_s21 = sadd.s32 1, %s2458_s18  ;;  %s2462_s19 = sphi %s2497_s19, %s14_s19   ;;  %s2458_s18 = sphi %s2495_s18, %s3754_s18   ;;  %s2454_s17 = sphi %s2493_s17, %s3753_s17   ;;  %s2450_s16 = sphi %s2491_s16, %s3752_s16   ;;  %s2446_s15 = sphi %s2489_s15, %s3751_s15  }
   0x4   : > { %p24_p0 = scmp.ge.s32.totalorder %s23_s20, 2  ;;  %p2014_p1 = scmp.ge.s32.totalorder %s2462_s19, 1 }
   0x5   : > { %p183_p2 = scmp.lt.s32.totalorder %s2462_s19, 5 }
   0x6   : > { %s3756_s20 = smov (%p24_p0, %s23_s20), 0  ;;  %s3758_s21 = smov (!%p24_p0, %s26_s21), %s2458_s18 }
   0x7   : > { %p184_p3 = pnand %p2014_p1, %p183_p2  ;;  %p28_p4 = scmp.ge.s32.totalorder %s3758_s21, 2 }
   0x9   : > { %s3760_s21 = smov (%p28_p4, %s3758_s21), 0  ;;  %187 = sbr.rel (%p184_p3) target bundleno = 679 (0x2a7), region = 36 }
  0x10   : > { %s2015_s22 = sshll.u32 %s2446_s15, 6  ;;  %p218_p5 = scmp.lt.s32.totalorder %s2450_s16, 1  ;;  %vm301_vm0 = vcmask 64512   ;;  %vm1855_vm1 = vcmask 195584  }
  0x11   : > { %p220_p6 = scmp.lt.s32.totalorder %s2015_s22, 127 }
  0x12   : > { %s3762_s16 = smov (!%p218_p5, %s2450_s16), 1 }
  0x13   : > { %s3764_s22 = smov (!%p220_p6, %s2015_s22), 127  ;;  %s2016_s23 = sshll.u32 %s3762_s16, 7 }
  0x14   : > { %s2519_s24 = sadd.s32 %s2016_s23, %s3764_s22 }
  0x15   : > { %s2017_s25 = sshll.u32 %s2519_s24, 3 }
  0x16   : > { %s2527_s28 = scalar_lea.vmem %s3644_s0, %s2017_s25  ;;  %s3499_s15 = scalar_lea.vmem %s3648_s4, %s2017_s25 }
  0x17   : > { %v2530_v0 = vld [vmem:[%s2527_s28] sm:$0xff]  ;;  %v2533_v1 = vld [vmem:[%s2527_s28 + $0x8] sm:$0xff]  ;;  %v2550_v8 = vld [vmem:[%s2527_s28 + $0x10] sm:$0xff] }
  0x18   : > { %v2536_v2 = vld [vmem:[%s2527_s28 + $0x100] sm:$0xff]  ;;  %v302_v3 = vsel %vm301_vm0, %v2530_v0, 0.0  ;;  %v305_v4 = vsel %vm301_vm0, %v2533_v1, 0.0  ;;  %v2543_v5 = vld [vmem:[%s2527_s28 + $0x108] sm:$0xff]  ;;  %v2553_v9 = vld [vmem:[%s2527_s28 + $0x110] sm:$0xff]  ;;  %v308_v10 = vsel %vm301_vm0, %v2550_v8, 0.0 }
  0x19   : > { %303 = vadd.xlane.f32.xlu0 %v302_v3  ;;  %306 = vadd.xlane.f32.xlu1 %v305_v4  ;;  %v398_v6 = vsel %vm301_vm0, %v2536_v2, 0.0  ;;  %v401_v7 = vsel %vm301_vm0, %v2543_v5, 0.0  ;;  %v404_v11 = vsel %vm301_vm0, %v2553_v9, 0.0  ;;  %v2560_v12 = vld [vmem:[%s2527_s28 + $0x18] sm:$0xff]  ;;  %v2570_v16 = vld [vmem:[%s2527_s28 + $0x20] sm:$0xff]  ;;  %v2580_v20 = vld [vmem:[%s2527_s28 + $0x28] sm:$0xff] }
  0x1a   : > { %v2563_v13 = vld [vmem:[%s2527_s28 + $0x118] sm:$0xff]  ;;  %v311_v14 = vsel %vm301_vm0, %v2560_v12, 0.0  ;;  %v2573_v17 = vld [vmem:[%s2527_s28 + $0x120] sm:$0xff]  ;;  %v314_v18 = vsel %vm301_vm0, %v2570_v16, 0.0  ;;  %v2583_v21 = vld [vmem:[%s2527_s28 + $0x128] sm:$0xff]  ;;  %v317_v22 = vsel %vm301_vm0, %v2580_v20, 0.0 }
  0x1b   : > { %v407_v15 = vsel %vm301_vm0, %v2563_v13, 0.0  ;;  %v410_v19 = vsel %vm301_vm0, %v2573_v17, 0.0  ;;  %v413_v23 = vsel %vm301_vm0, %v2583_v21, 0.0  ;;  %v2590_v24 = vld [vmem:[%s2527_s28 + $0x30] sm:$0xff]  ;;  %v2600_v28 = vld [vmem:[%s2527_s28 + $0x38] sm:$0xff]  ;;  %v2610_v32 = vld [vmem:[%s2527_s28 + $0x40] sm:$0xff] }
  0x1c   : > { %v2593_v25 = vld [vmem:[%s2527_s28 + $0x130] sm:$0xff]  ;;  %v320_v26 = vsel %vm301_vm0, %v2590_v24, 0.0  ;;  %v2603_v29 = vld [vmem:[%s2527_s28 + $0x138] sm:$0xff]  ;;  %v323_v30 = vsel %vm301_vm0, %v2600_v28, 0.0  ;;  %v2613_v33 = vld [vmem:[%s2527_s28 + $0x140] sm:$0xff]  ;;  %v326_v34 = vsel %vm301_vm0, %v2610_v32, 0.0 }
  0x1d   : > { %399 = vadd.xlane.f32.xlu0 %v398_v6  ;;  %402 = vadd.xlane.f32.xlu1 %v401_v7  ;;  %v416_v27 = vsel %vm301_vm0, %v2593_v25, 0.0  ;;  %v419_v31 = vsel %vm301_vm0, %v2603_v29, 0.0  ;;  %v422_v35 = vsel %vm301_vm0, %v2613_v33, 0.0  ;;  %v2620_v36 = vld [vmem:[%s2527_s28 + $0x48] sm:$0xff]  ;;  %v2630_v40 = vld [vmem:[%s2527_s28 + $0x50] sm:$0xff]  ;;  %v2640_v44 = vld [vmem:[%s2527_s28 + $0x58] sm:$0xff] }
  0x1e   : > { %v2623_v37 = vld [vmem:[%s2527_s28 + $0x148] sm:$0xff]  ;;  %v329_v38 = vsel %vm301_vm0, %v2620_v36, 0.0  ;;  %v2633_v41 = vld [vmem:[%s2527_s28 + $0x150] sm:$0xff]  ;;  %v332_v42 = vsel %vm301_vm0, %v2630_v40, 0.0  ;;  %v2643_v45 = vld [vmem:[%s2527_s28 + $0x158] sm:$0xff]  ;;  %v335_v46 = vsel %vm301_vm0, %v2640_v44, 0.0 }
  0x1f   : > { %v425_v39 = vsel %vm301_vm0, %v2623_v37, 0.0  ;;  %v428_v43 = vsel %vm301_vm0, %v2633_v41, 0.0  ;;  %v431_v47 = vsel %vm301_vm0, %v2643_v45, 0.0  ;;  %v2650_v48 = vld [vmem:[%s2527_s28 + $0x60] sm:$0xff]  ;;  %v2660_v52 = vld [vmem:[%s2527_s28 + $0x68] sm:$0xff]  ;;  %v2670_v56 = vld [vmem:[%s2527_s28 + $0x70] sm:$0xff] }
  0x20   : > { %v2653_v49 = vld [vmem:[%s2527_s28 + $0x160] sm:$0xff]  ;;  %v338_v50 = vsel %vm301_vm0, %v2650_v48, 0.0  ;;  %v2663_v53 = vld [vmem:[%s2527_s28 + $0x168] sm:$0xff]  ;;  %v341_v54 = vsel %vm301_vm0, %v2660_v52, 0.0  ;;  %v2673_v57 = vld [vmem:[%s2527_s28 + $0x170] sm:$0xff]  ;;  %v344_v58 = vsel %vm301_vm0, %v2670_v56, 0.0 }
  0x21   : > { %309 = vadd.xlane.f32.xlu0 %v308_v10  ;;  %405 = vadd.xlane.f32.xlu1 %v404_v11  ;;  %v434_v51 = vsel %vm301_vm0, %v2653_v49, 0.0  ;;  %v437_v55 = vsel %vm301_vm0, %v2663_v53, 0.0  ;;  %v440_v59 = vsel %vm301_vm0, %v2673_v57, 0.0  ;;  %v2680_v60 = vld [vmem:[%s2527_s28 + $0x78] sm:$0xff]  ;;  %v2690_v3 = vld [vmem:[%s2527_s28 + $0x80] sm:$0xff]  ;;  %v2700_v10 = vld [vmem:[%s2527_s28 + $0x88] sm:$0xff] }
  0x22   : > { %v2683_v61 = vld [vmem:[%s2527_s28 + $0x178] sm:$0xff]  ;;  %v347_v62 = vsel %vm301_vm0, %v2680_v60, 0.0  ;;  %v2693_v4 = vld [vmem:[%s2527_s28 + $0x180] sm:$0xff]  ;;  %v350_v6 = vsel %vm301_vm0, %v2690_v3, 0.0  ;;  %v2703_v11 = vld [vmem:[%s2527_s28 + $0x188] sm:$0xff] }
  0x23   : > { %v443_v63 = vsel %vm301_vm0, %v2683_v61, 0.0  ;;  %v446_v7 = vsel %vm301_vm0, %v2693_v4, 0.0 }
  0x25   : > { %312 = vadd.xlane.f32.xlu0 %v311_v14  ;;  %408 = vadd.xlane.f32.xlu1 %v407_v15  ;;  %v353_v14 = vsel %vm301_vm0, %v2700_v10, 0.0  ;;  %v449_v15 = vsel %vm301_vm0, %v2703_v11, 0.0 }
  0x29   : > { %315 = vadd.xlane.f32.xlu0 %v314_v18  ;;  %411 = vadd.xlane.f32.xlu1 %v410_v19  ;;  %v2710_v18 = vld [vmem:[%s2527_s28 + $0x90] sm:$0xff] }
  0x2a   : > { %v2713_v19 = vld [vmem:[%s2527_s28 + $0x190] sm:$0xff] }
  0x2d   : > { %318 = vadd.xlane.f32.xlu0 %v317_v22  ;;  %414 = vadd.xlane.f32.xlu1 %v413_v23  ;;  %v356_v22 = vsel %vm301_vm0, %v2710_v18, 0.0  ;;  %v452_v23 = vsel %vm301_vm0, %v2713_v19, 0.0 }
  0x31   : > { %321 = vadd.xlane.f32.xlu0 %v320_v26  ;;  %417 = vadd.xlane.f32.xlu1 %v416_v27  ;;  %v2720_v26 = vld [vmem:[%s2527_s28 + $0x98] sm:$0xff] }
  0x32   : > { %v2723_v27 = vld [vmem:[%s2527_s28 + $0x198] sm:$0xff] }
  0x35   : > { %324 = vadd.xlane.f32.xlu0 %v323_v30  ;;  %420 = vadd.xlane.f32.xlu1 %v419_v31  ;;  %v359_v30 = vsel %vm301_vm0, %v2720_v26, 0.0  ;;  %v455_v31 = vsel %vm301_vm0, %v2723_v27, 0.0 }
  0x39   : > { %327 = vadd.xlane.f32.xlu0 %v326_v34  ;;  %423 = vadd.xlane.f32.xlu1 %v422_v35  ;;  %v2730_v34 = vld [vmem:[%s2527_s28 + $0xa0] sm:$0xff] }
  0x3a   : > { %v2733_v35 = vld [vmem:[%s2527_s28 + $0x1a0] sm:$0xff] }
  0x3d   : > { %330 = vadd.xlane.f32.xlu0 %v329_v38  ;;  %426 = vadd.xlane.f32.xlu1 %v425_v39  ;;  %v362_v38 = vsel %vm301_vm0, %v2730_v34, 0.0  ;;  %v458_v39 = vsel %vm301_vm0, %v2733_v35, 0.0 }
  0x41   : > { %333 = vadd.xlane.f32.xlu0 %v332_v42  ;;  %429 = vadd.xlane.f32.xlu1 %v428_v43  ;;  %v2740_v42 = vld [vmem:[%s2527_s28 + $0xa8] sm:$0xff] }
  0x42   : > { %v2743_v43 = vld [vmem:[%s2527_s28 + $0x1a8] sm:$0xff] }
  0x45   : > { %336 = vadd.xlane.f32.xlu0 %v335_v46  ;;  %432 = vadd.xlane.f32.xlu1 %v431_v47  ;;  %v365_v46 = vsel %vm301_vm0, %v2740_v42, 0.0  ;;  %v461_v47 = vsel %vm301_vm0, %v2743_v43, 0.0 }
  0x49   : > { %339 = vadd.xlane.f32.xlu0 %v338_v50  ;;  %435 = vadd.xlane.f32.xlu1 %v434_v51  ;;  %v2750_v50 = vld [vmem:[%s2527_s28 + $0xb0] sm:$0xff] }
  0x4a   : > { %v2753_v51 = vld [vmem:[%s2527_s28 + $0x1b0] sm:$0xff] }
  0x4d   : > { %342 = vadd.xlane.f32.xlu0 %v341_v54  ;;  %438 = vadd.xlane.f32.xlu1 %v437_v55  ;;  %v368_v54 = vsel %vm301_vm0, %v2750_v50, 0.0  ;;  %v464_v55 = vsel %vm301_vm0, %v2753_v51, 0.0 }
  0x51   : > { %345 = vadd.xlane.f32.xlu0 %v344_v58  ;;  %441 = vadd.xlane.f32.xlu1 %v440_v59  ;;  %v2760_v58 = vld [vmem:[%s2527_s28 + $0xb8] sm:$0xff] }
  0x52   : > { %v2763_v59 = vld [vmem:[%s2527_s28 + $0x1b8] sm:$0xff] }
  0x55   : > { %348 = vadd.xlane.f32.xlu0 %v347_v62  ;;  %444 = vadd.xlane.f32.xlu1 %v443_v63  ;;  %v371_v62 = vsel %vm301_vm0, %v2760_v58, 0.0  ;;  %v467_v63 = vsel %vm301_vm0, %v2763_v59, 0.0 }
  0x59   : > { %351 = vadd.xlane.f32.xlu0 %v350_v6  ;;  %447 = vadd.xlane.f32.xlu1 %v446_v7  ;;  %v2770_v6 = vld [vmem:[%s2527_s28 + $0xc0] sm:$0xff] }
  0x5a   : > { %v2773_v7 = vld [vmem:[%s2527_s28 + $0x1c0] sm:$0xff] }
  0x5d   : > { %354 = vadd.xlane.f32.xlu0 %v353_v14  ;;  %450 = vadd.xlane.f32.xlu1 %v449_v15  ;;  %v374_v14 = vsel %vm301_vm0, %v2770_v6, 0.0  ;;  %v470_v15 = vsel %vm301_vm0, %v2773_v7, 0.0 }
  0x61   : > { %357 = vadd.xlane.f32.xlu0 %v356_v22  ;;  %453 = vadd.xlane.f32.xlu1 %v452_v23  ;;  %v2780_v22 = vld [vmem:[%s2527_s28 + $0xc8] sm:$0xff] }
  0x62   : > { %3683 = vst [vmem:[#allocation2_spill] sm:$0xff] %v2780_v22  ;;  %v2783_v23 = vld [vmem:[%s2527_s28 + $0x1c8] sm:$0xff] }
  0x63   : > { %3684 = vst [vmem:[#allocation3_spill] sm:$0xff] %v2783_v23 }
  0x65   : > { %360 = vadd.xlane.f32.xlu0 %v359_v30  ;;  %456 = vadd.xlane.f32.xlu1 %v455_v31  ;;  %v377_v30 = vsel %vm301_vm0, %v2780_v22, 0.0  ;;  %v473_v31 = vsel %vm301_vm0, %v2783_v23, 0.0 }
  0x69   : > { %363 = vadd.xlane.f32.xlu0 %v362_v38  ;;  %459 = vadd.xlane.f32.xlu1 %v458_v39  ;;  %v2790_v38 = vld [vmem:[%s2527_s28 + $0xd0] sm:$0xff] }
  0x6a   : > { %3685 = vst [vmem:[#allocation4_spill] sm:$0xff] %v2790_v38  ;;  %v2793_v39 = vld [vmem:[%s2527_s28 + $0x1d0] sm:$0xff] }
  0x6b   : > { %3686 = vst [vmem:[#allocation5_spill] sm:$0xff] %v2793_v39 }
  0x6d   : > { %366 = vadd.xlane.f32.xlu0 %v365_v46  ;;  %462 = vadd.xlane.f32.xlu1 %v461_v47  ;;  %v380_v46 = vsel %vm301_vm0, %v2790_v38, 0.0  ;;  %v476_v47 = vsel %vm301_vm0, %v2793_v39, 0.0 }
  0x71   : > { %369 = vadd.xlane.f32.xlu0 %v368_v54  ;;  %465 = vadd.xlane.f32.xlu1 %v464_v55  ;;  %v2800_v54 = vld [vmem:[%s2527_s28 + $0xd8] sm:$0xff] }
  0x72   : > { %3687 = vst [vmem:[#allocation6_spill] sm:$0xff] %v2800_v54  ;;  %v2803_v55 = vld [vmem:[%s2527_s28 + $0x1d8] sm:$0xff] }
  0x73   : > { %3688 = vst [vmem:[#allocation7_spill] sm:$0xff] %v2803_v55 }
  0x75   : > { %372 = vadd.xlane.f32.xlu0 %v371_v62  ;;  %468 = vadd.xlane.f32.xlu1 %v467_v63  ;;  %v383_v62 = vsel %vm301_vm0, %v2800_v54, 0.0  ;;  %v479_v63 = vsel %vm301_vm0, %v2803_v55, 0.0  ;;  %v2833_v54 = vld [vmem:[%s2527_s28 + $0x1f0] sm:$0xff] }
  0x76   : > { %3694 = vst [vmem:[#allocation13_spill] sm:$0xff] %v2833_v54 }
  0x79   : > { %375 = vadd.xlane.f32.xlu0 %v374_v14  ;;  %471 = vadd.xlane.f32.xlu1 %v470_v15  ;;  %v2810_v14 = vld [vmem:[%s2527_s28 + $0xe0] sm:$0xff] }
  0x7a   : > { %3689 = vst [vmem:[#allocation8_spill] sm:$0xff] %v2810_v14  ;;  %v2813_v15 = vld [vmem:[%s2527_s28 + $0x1e0] sm:$0xff] }
  0x7b   : > { %3690 = vst [vmem:[#allocation9_spill] sm:$0xff] %v2813_v15 }
  0x7d   : > { %378 = vadd.xlane.f32.xlu0 %v377_v30  ;;  %474 = vadd.xlane.f32.xlu1 %v473_v31  ;;  %v386_v30 = vsel %vm301_vm0, %v2810_v14, 0.0  ;;  %v482_v31 = vsel %vm301_vm0, %v2813_v15, 0.0  ;;  %v488_v14 = vsel %vm301_vm0, %v2833_v54, 0.0 }
  0x81   : > { %381 = vadd.xlane.f32.xlu0 %v380_v46  ;;  %477 = vadd.xlane.f32.xlu1 %v476_v47  ;;  %v2820_v46 = vld [vmem:[%s2527_s28 + $0xe8] sm:$0xff] }
  0x82   : > { %3691 = vst [vmem:[#allocation10_spill] sm:$0xff] %v2820_v46  ;;  %v2823_v47 = vld [vmem:[%s2527_s28 + $0x1e8] sm:$0xff]  ;;  %v389_v55 = vsel %vm301_vm0, %v2820_v46, 0.0 }
  0x83   : > { %3692 = vst [vmem:[#allocation11_spill] sm:$0xff] %v2823_v47 }
  0x85   : > { %384 = vadd.xlane.f32.xlu0 %v383_v62  ;;  %480 = vadd.xlane.f32.xlu1 %v479_v63  ;;  %v485_v62 = vsel %vm301_vm0, %v2823_v47, 0.0  ;;  %v2830_v63 = vld [vmem:[%s2527_s28 + $0xf0] sm:$0xff] }
  0x86   : > { %3693 = vst [vmem:[#allocation12_spill] sm:$0xff] %v2830_v63  ;;  %v392_v15 = vsel %vm301_vm0, %v2830_v63, 0.0 }
  0x89   : > { %387 = vadd.xlane.f32.xlu0 %v386_v30  ;;  %483 = vadd.xlane.f32.xlu1 %v482_v31  ;;  %v2840_v30 = vld [vmem:[%s2527_s28 + $0xf8] sm:$0xff] }
  0x8a   : > { %3695 = vst [vmem:[#allocation14_spill] sm:$0xff] %v2840_v30  ;;  %v2843_v31 = vld [vmem:[%s2527_s28 + $0x1f8] sm:$0xff]  ;;  %v395_v47 = vsel %vm301_vm0, %v2840_v30, 0.0 }
  0x8b   : > { %v491_v46 = vsel %vm301_vm0, %v2843_v31, 0.0 }
  0x8d   : > { %390 = vadd.xlane.f32.xlu0 %v389_v55  ;;  %486 = vadd.xlane.f32.xlu1 %v485_v62 }
  0x91   : > { %393 = vadd.xlane.f32.xlu0 %v392_v15  ;;  %489 = vadd.xlane.f32.xlu1 %v488_v14 }
  0x95   : > { %396 = vadd.xlane.f32.xlu0 %v395_v47  ;;  %492 = vadd.xlane.f32.xlu1 %v491_v46 }
  0xa6   : > { %v304_v55 = vpop.xlane.xlu0 %303  ;;  %v307_v62 = vpop.xlane.xlu1 %306 }
  0xa7   : > { %v495_v63 = vmul.f32 0.125, %v304_v55  ;;  %v496_v39 = vmul.f32 0.125, %v307_v62 }
  0xa9   : > { %v2850_v54 = vsub.f32 %v2530_v0, %v495_v63  ;;  %v2853_v38 = vsub.f32 %v2533_v1, %v496_v39 }
  0xaa   : > { %v400_v15 = vpop.xlane.xlu0 %399  ;;  %v403_v14 = vpop.xlane.xlu1 %402 }
  0xab   : > { %3696 = vst [vmem:[#allocation15_spill] sm:$0xff] %v2853_v38  ;;  %v527_v23 = vmul.f32 0.125, %v400_v15  ;;  %v528_v22 = vmul.f32 0.125, %v403_v14  ;;  %v623_v30 = vmul.f32 %v2850_v54, %v2850_v54  ;;  %v624_v46 = vmul.f32 %v2853_v38, %v2853_v38 }
  0xad   : > { %v2860_v47 = vsub.f32 %v2536_v2, %v527_v23  ;;  %v2863_v55 = vsub.f32 %v2543_v5, %v528_v22  ;;  %v687_v0 = vsel %vm301_vm0, %v623_v30, 0.0  ;;  %v690_v63 = vsel %vm301_vm0, %v624_v46, 0.0 }
  0xae   : > { %688 = vadd.xlane.f32.xlu0 %v687_v0  ;;  %v310_v1 = vpop.xlane.xlu0 %309  ;;  %v406_v39 = vpop.xlane.xlu1 %405 }
  0xaf   : > { %v497_v62 = vmul.f32 0.125, %v310_v1  ;;  %v529_v15 = vmul.f32 0.125, %v406_v39  ;;  %v655_v14 = vmul.f32 %v2860_v47, %v2860_v47  ;;  %v656_v38 = vmul.f32 %v2863_v55, %v2863_v55 }
  0xb1   : > { %v2872_v2 = vsub.f32 %v2550_v8, %v497_v62  ;;  %v2875_v5 = vsub.f32 %v2553_v9, %v529_v15  ;;  %v783_v22 = vsel %vm301_vm0, %v655_v14, 0.0  ;;  %v786_v46 = vsel %vm301_vm0, %v656_v38, 0.0 }
  0xb2   : > { %691 = vadd.xlane.f32.xlu0 %v690_v63  ;;  %784 = vadd.xlane.f32.xlu1 %v783_v22  ;;  %v313_v23 = vpop.xlane.xlu0 %312  ;;  %v409_v30 = vpop.xlane.xlu1 %408 }
  0xb3   : > { %v498_v0 = vmul.f32 0.125, %v313_v23  ;;  %v530_v1 = vmul.f32 0.125, %v409_v30  ;;  %v625_v39 = vmul.f32 %v2872_v2, %v2872_v2  ;;  %v657_v8 = vmul.f32 %v2875_v5, %v2875_v5 }
  0xb5   : > { %v2884_v62 = vsub.f32 %v2560_v12, %v498_v0  ;;  %v2887_v9 = vsub.f32 %v2563_v13, %v530_v1  ;;  %v693_v63 = vsel %vm301_vm0, %v625_v39, 0.0  ;;  %v789_v14 = vsel %vm301_vm0, %v657_v8, 0.0 }
  0xb6   : > { %787 = vadd.xlane.f32.xlu1 %v786_v46  ;;  %694 = vadd.xlane.f32.xlu0 %v693_v63  ;;  %v316_v15 = vpop.xlane.xlu0 %315  ;;  %v412_v38 = vpop.xlane.xlu1 %411 }
  0xb7   : > { %v499_v22 = vmul.f32 0.125, %v316_v15  ;;  %v531_v23 = vmul.f32 0.125, %v412_v38  ;;  %v626_v30 = vmul.f32 %v2884_v62, %v2884_v62  ;;  %v658_v12 = vmul.f32 %v2887_v9, %v2887_v9 }
  0xb9   : > { %v2896_v0 = vsub.f32 %v2570_v16, %v499_v22  ;;  %v2899_v13 = vsub.f32 %v2573_v17, %v531_v23  ;;  %v696_v46 = vsel %vm301_vm0, %v626_v30, 0.0  ;;  %v792_v8 = vsel %vm301_vm0, %v658_v12, 0.0 }
  0xba   : > { %790 = vadd.xlane.f32.xlu1 %v789_v14  ;;  %697 = vadd.xlane.f32.xlu0 %v696_v46  ;;  %v319_v1 = vpop.xlane.xlu0 %318  ;;  %v415_v39 = vpop.xlane.xlu1 %414 }
  0xbb   : > { %v500_v63 = vmul.f32 0.125, %v319_v1  ;;  %v532_v15 = vmul.f32 0.125, %v415_v39  ;;  %v627_v38 = vmul.f32 %v2896_v0, %v2896_v0  ;;  %v659_v16 = vmul.f32 %v2899_v13, %v2899_v13 }
  0xbd   : > { %v2908_v22 = vsub.f32 %v2580_v20, %v500_v63  ;;  %v2911_v17 = vsub.f32 %v2583_v21, %v532_v15  ;;  %v699_v14 = vsel %vm301_vm0, %v627_v38, 0.0  ;;  %v795_v12 = vsel %vm301_vm0, %v659_v16, 0.0 }
  0xbe   : > { %793 = vadd.xlane.f32.xlu1 %v792_v8  ;;  %700 = vadd.xlane.f32.xlu0 %v699_v14  ;;  %v322_v23 = vpop.xlane.xlu0 %321  ;;  %v418_v30 = vpop.xlane.xlu1 %417 }
  0xbf   : > { %v501_v46 = vmul.f32 0.125, %v322_v23  ;;  %v533_v1 = vmul.f32 0.125, %v418_v30  ;;  %v628_v39 = vmul.f32 %v2908_v22, %v2908_v22  ;;  %v660_v20 = vmul.f32 %v2911_v17, %v2911_v17 }
  0xc1   : > { %v2920_v63 = vsub.f32 %v2590_v24, %v501_v46  ;;  %v2923_v21 = vsub.f32 %v2593_v25, %v533_v1  ;;  %v702_v8 = vsel %vm301_vm0, %v628_v39, 0.0  ;;  %v798_v16 = vsel %vm301_vm0, %v660_v20, 0.0 }
  0xc2   : > { %796 = vadd.xlane.f32.xlu1 %v795_v12  ;;  %703 = vadd.xlane.f32.xlu0 %v702_v8  ;;  %v325_v15 = vpop.xlane.xlu0 %324  ;;  %v421_v38 = vpop.xlane.xlu1 %420 }
  0xc3   : > { %v502_v14 = vmul.f32 0.125, %v325_v15  ;;  %v534_v23 = vmul.f32 0.125, %v421_v38  ;;  %v629_v30 = vmul.f32 %v2920_v63, %v2920_v63  ;;  %v661_v24 = vmul.f32 %v2923_v21, %v2923_v21 }
  0xc5   : > { %v2932_v46 = vsub.f32 %v2600_v28, %v502_v14  ;;  %v2935_v25 = vsub.f32 %v2603_v29, %v534_v23  ;;  %v705_v12 = vsel %vm301_vm0, %v629_v30, 0.0  ;;  %v801_v20 = vsel %vm301_vm0, %v661_v24, 0.0 }
  0xc6   : > { %799 = vadd.xlane.f32.xlu1 %v798_v16  ;;  %706 = vadd.xlane.f32.xlu0 %v705_v12  ;;  %v328_v1 = vpop.xlane.xlu0 %327  ;;  %v424_v39 = vpop.xlane.xlu1 %423 }
  0xc7   : > { %v503_v8 = vmul.f32 0.125, %v328_v1  ;;  %v535_v15 = vmul.f32 0.125, %v424_v39  ;;  %v630_v38 = vmul.f32 %v2932_v46, %v2932_v46  ;;  %v662_v28 = vmul.f32 %v2935_v25, %v2935_v25 }
  0xc9   : > { %v2944_v14 = vsub.f32 %v2610_v32, %v503_v8  ;;  %v2947_v29 = vsub.f32 %v2613_v33, %v535_v15  ;;  %v708_v16 = vsel %vm301_vm0, %v630_v38, 0.0  ;;  %v804_v24 = vsel %vm301_vm0, %v662_v28, 0.0 }
  0xca   : > { %802 = vadd.xlane.f32.xlu1 %v801_v20  ;;  %709 = vadd.xlane.f32.xlu0 %v708_v16  ;;  %v331_v23 = vpop.xlane.xlu0 %330  ;;  %v427_v30 = vpop.xlane.xlu1 %426 }
  0xcb   : > { %v504_v12 = vmul.f32 0.125, %v331_v23  ;;  %v536_v1 = vmul.f32 0.125, %v427_v30  ;;  %v631_v39 = vmul.f32 %v2944_v14, %v2944_v14  ;;  %v663_v32 = vmul.f32 %v2947_v29, %v2947_v29 }
  0xcd   : > { %v2956_v8 = vsub.f32 %v2620_v36, %v504_v12  ;;  %v2959_v33 = vsub.f32 %v2623_v37, %v536_v1  ;;  %v711_v20 = vsel %vm301_vm0, %v631_v39, 0.0  ;;  %v807_v28 = vsel %vm301_vm0, %v663_v32, 0.0 }
  0xce   : > { %805 = vadd.xlane.f32.xlu1 %v804_v24  ;;  %712 = vadd.xlane.f32.xlu0 %v711_v20  ;;  %v334_v15 = vpop.xlane.xlu0 %333  ;;  %v430_v38 = vpop.xlane.xlu1 %429 }
  0xcf   : > { %v505_v16 = vmul.f32 0.125, %v334_v15  ;;  %v537_v23 = vmul.f32 0.125, %v430_v38  ;;  %v632_v30 = vmul.f32 %v2956_v8, %v2956_v8  ;;  %v664_v36 = vmul.f32 %v2959_v33, %v2959_v33 }
  0xd1   : > { %v2968_v12 = vsub.f32 %v2630_v40, %v505_v16  ;;  %v2971_v37 = vsub.f32 %v2633_v41, %v537_v23  ;;  %v714_v24 = vsel %vm301_vm0, %v632_v30, 0.0  ;;  %v810_v32 = vsel %vm301_vm0, %v664_v36, 0.0  ;;  %v1277_v41 = vld [vmem:[%s3647_s3] sm:$0xff] }
  0xd2   : > { %808 = vadd.xlane.f32.xlu1 %v807_v28  ;;  %715 = vadd.xlane.f32.xlu0 %v714_v24  ;;  %v337_v1 = vpop.xlane.xlu0 %336  ;;  %v433_v39 = vpop.xlane.xlu1 %432 }
  0xd3   : > { %3697 = vst [vmem:[#allocation16_spill] sm:$0xff] %v2971_v37  ;;  %v506_v20 = vmul.f32 0.125, %v337_v1  ;;  %v538_v15 = vmul.f32 0.125, %v433_v39  ;;  %v633_v38 = vmul.f32 %v2968_v12, %v2968_v12  ;;  %v665_v40 = vmul.f32 %v2971_v37, %v2971_v37  ;;  %2154 = vmatprep.subr.mxu0 %v1277_v41  ;;  %2252 = vmatprep.subr.mxu1 %v1277_v41 }
  0xd4   : > { %2155 = vmatpush3.msra.mxu0 %v1277_v41  ;;  %2253 = vmatpush3.msra.mxu1 %v1277_v41 }
  0xd5   : > { %v2983_v28 = vsub.f32 %v2640_v44, %v506_v20  ;;  %v2986_v16 = vsub.f32 %v2643_v45, %v538_v15  ;;  %v717_v23 = vsel %vm301_vm0, %v633_v38, 0.0  ;;  %v813_v24 = vsel %vm301_vm0, %v665_v40, 0.0 }
  0xd6   : > { %811 = vadd.xlane.f32.xlu1 %v810_v32  ;;  %718 = vadd.xlane.f32.xlu0 %v717_v23  ;;  %v340_v30 = vpop.xlane.xlu0 %339  ;;  %v436_v36 = vpop.xlane.xlu1 %435 }
  0xd7   : > { %v507_v1 = vmul.f32 0.125, %v340_v30  ;;  %v539_v39 = vmul.f32 0.125, %v436_v36  ;;  %v634_v37 = vmul.f32 %v2983_v28, %v2983_v28  ;;  %v666_v44 = vmul.f32 %v2986_v16, %v2986_v16 }
  0xd9   : > { %v2995_v45 = vsub.f32 %v2650_v48, %v507_v1  ;;  %v2998_v20 = vsub.f32 %v2653_v49, %v539_v39  ;;  %v720_v32 = vsel %vm301_vm0, %v634_v37, 0.0  ;;  %v816_v40 = vsel %vm301_vm0, %v666_v44, 0.0 }
  0xda   : > { %814 = vadd.xlane.f32.xlu1 %v813_v24  ;;  %721 = vadd.xlane.f32.xlu0 %v720_v32  ;;  %v343_v15 = vpop.xlane.xlu0 %342  ;;  %v439_v38 = vpop.xlane.xlu1 %438 }
  0xdb   : > { %v508_v41 = vmul.f32 0.125, %v343_v15  ;;  %v540_v23 = vmul.f32 0.125, %v439_v38  ;;  %v635_v30 = vmul.f32 %v2995_v45, %v2995_v45  ;;  %v667_v48 = vmul.f32 %v2998_v20, %v2998_v20 }
  0xdd   : > { %v3007_v36 = vsub.f32 %v2660_v52, %v508_v41  ;;  %v3010_v49 = vsub.f32 %v2663_v53, %v540_v23  ;;  %v723_v37 = vsel %vm301_vm0, %v635_v30, 0.0  ;;  %v819_v39 = vsel %vm301_vm0, %v667_v48, 0.0 }
  0xde   : > { %817 = vadd.xlane.f32.xlu1 %v816_v40  ;;  %724 = vadd.xlane.f32.xlu0 %v723_v37  ;;  %v346_v24 = vpop.xlane.xlu0 %345  ;;  %v442_v1 = vpop.xlane.xlu1 %441 }
  0xdf   : > { %v509_v44 = vmul.f32 0.125, %v346_v24  ;;  %v541_v32 = vmul.f32 0.125, %v442_v1  ;;  %v636_v15 = vmul.f32 %v3007_v36, %v3007_v36  ;;  %v668_v52 = vmul.f32 %v3010_v49, %v3010_v49 }
  0xe1   : > { %v3019_v38 = vsub.f32 %v2670_v56, %v509_v44  ;;  %v3022_v53 = vsub.f32 %v2673_v57, %v541_v32  ;;  %v726_v40 = vsel %vm301_vm0, %v636_v15, 0.0  ;;  %v822_v30 = vsel %vm301_vm0, %v668_v52, 0.0 }
  0xe2   : > { %820 = vadd.xlane.f32.xlu1 %v819_v39  ;;  %727 = vadd.xlane.f32.xlu0 %v726_v40  ;;  %v349_v41 = vpop.xlane.xlu0 %348  ;;  %v445_v23 = vpop.xlane.xlu1 %444 }
  0xe3   : > { %v510_v48 = vmul.f32 0.125, %v349_v41  ;;  %v542_v37 = vmul.f32 0.125, %v445_v23  ;;  %v637_v24 = vmul.f32 %v3019_v38, %v3019_v38  ;;  %v669_v56 = vmul.f32 %v3022_v53, %v3022_v53 }
  0xe5   : > { %v3031_v1 = vsub.f32 %v2680_v60, %v510_v48  ;;  %v3034_v57 = vsub.f32 %v2683_v61, %v542_v37  ;;  %v729_v39 = vsel %vm301_vm0, %v637_v24, 0.0  ;;  %v825_v15 = vsel %vm301_vm0, %v669_v56, 0.0 }
  0xe6   : > { %823 = vadd.xlane.f32.xlu1 %v822_v30  ;;  %730 = vadd.xlane.f32.xlu0 %v729_v39  ;;  %v352_v44 = vpop.xlane.xlu0 %351  ;;  %v448_v32 = vpop.xlane.xlu1 %447 }
  0xe7   : > { %v511_v52 = vmul.f32 0.125, %v352_v44  ;;  %v543_v40 = vmul.f32 0.125, %v448_v32  ;;  %v638_v41 = vmul.f32 %v3031_v1, %v3031_v1  ;;  %v670_v60 = vmul.f32 %v3034_v57, %v3034_v57 }
  0xe9   : > { %v3043_v23 = vsub.f32 %v2690_v3, %v511_v52  ;;  %v3046_v61 = vsub.f32 %v2693_v4, %v543_v40  ;;  %v732_v30 = vsel %vm301_vm0, %v638_v41, 0.0  ;;  %v828_v24 = vsel %vm301_vm0, %v670_v60, 0.0 }
  0xea   : > { %826 = vadd.xlane.f32.xlu1 %v825_v15  ;;  %733 = vadd.xlane.f32.xlu0 %v732_v30  ;;  %v355_v48 = vpop.xlane.xlu0 %354  ;;  %v451_v37 = vpop.xlane.xlu1 %450 }
  0xeb   : > { %v512_v56 = vmul.f32 0.125, %v355_v48  ;;  %v544_v39 = vmul.f32 0.125, %v451_v37  ;;  %v639_v44 = vmul.f32 %v3043_v23, %v3043_v23  ;;  %v671_v3 = vmul.f32 %v3046_v61, %v3046_v61 }
  0xed   : > { %v3055_v32 = vsub.f32 %v2700_v10, %v512_v56  ;;  %v3058_v4 = vsub.f32 %v2703_v11, %v544_v39  ;;  %v735_v15 = vsel %vm301_vm0, %v639_v44, 0.0  ;;  %v831_v41 = vsel %vm301_vm0, %v671_v3, 0.0 }
  0xee   : > { %829 = vadd.xlane.f32.xlu1 %v828_v24  ;;  %736 = vadd.xlane.f32.xlu0 %v735_v15  ;;  %v358_v52 = vpop.xlane.xlu0 %357  ;;  %v454_v40 = vpop.xlane.xlu1 %453 }
  0xef   : > { %v513_v60 = vmul.f32 0.125, %v358_v52  ;;  %v545_v30 = vmul.f32 0.125, %v454_v40  ;;  %v640_v48 = vmul.f32 %v3055_v32, %v3055_v32  ;;  %v672_v10 = vmul.f32 %v3058_v4, %v3058_v4 }
  0xf1   : > { %v3067_v37 = vsub.f32 %v2710_v18, %v513_v60  ;;  %v3070_v11 = vsub.f32 %v2713_v19, %v545_v30  ;;  %v738_v24 = vsel %vm301_vm0, %v640_v48, 0.0  ;;  %v834_v44 = vsel %vm301_vm0, %v672_v10, 0.0 }
  0xf2   : > { %832 = vadd.xlane.f32.xlu1 %v831_v41  ;;  %739 = vadd.xlane.f32.xlu0 %v738_v24  ;;  %v361_v56 = vpop.xlane.xlu0 %360  ;;  %v457_v39 = vpop.xlane.xlu1 %456 }
  0xf3   : > { %v514_v3 = vmul.f32 0.125, %v361_v56  ;;  %v546_v15 = vmul.f32 0.125, %v457_v39  ;;  %v641_v52 = vmul.f32 %v3067_v37, %v3067_v37  ;;  %v673_v18 = vmul.f32 %v3070_v11, %v3070_v11 }
  0xf5   : > { %v3079_v40 = vsub.f32 %v2720_v26, %v514_v3  ;;  %v3082_v19 = vsub.f32 %v2723_v27, %v546_v15  ;;  %v741_v41 = vsel %vm301_vm0, %v641_v52, 0.0  ;;  %v837_v48 = vsel %vm301_vm0, %v673_v18, 0.0 }
  0xf6   : > { %835 = vadd.xlane.f32.xlu1 %v834_v44  ;;  %742 = vadd.xlane.f32.xlu0 %v741_v41  ;;  %v364_v60 = vpop.xlane.xlu0 %363  ;;  %v460_v30 = vpop.xlane.xlu1 %459 }
  0xf7   : > { %v515_v10 = vmul.f32 0.125, %v364_v60  ;;  %v547_v24 = vmul.f32 0.125, %v460_v30  ;;  %v642_v56 = vmul.f32 %v3079_v40, %v3079_v40  ;;  %v674_v26 = vmul.f32 %v3082_v19, %v3082_v19 }
  0xf9   : > { %v3091_v39 = vsub.f32 %v2730_v34, %v515_v10  ;;  %v3094_v27 = vsub.f32 %v2733_v35, %v547_v24  ;;  %v744_v44 = vsel %vm301_vm0, %v642_v56, 0.0  ;;  %v840_v52 = vsel %vm301_vm0, %v674_v26, 0.0 }
  0xfa   : > { %838 = vadd.xlane.f32.xlu1 %v837_v48  ;;  %745 = vadd.xlane.f32.xlu0 %v744_v44  ;;  %v367_v3 = vpop.xlane.xlu0 %366  ;;  %v463_v15 = vpop.xlane.xlu1 %462 }
  0xfb   : > { %v516_v18 = vmul.f32 0.125, %v367_v3  ;;  %v548_v41 = vmul.f32 0.125, %v463_v15  ;;  %v643_v60 = vmul.f32 %v3091_v39, %v3091_v39  ;;  %v675_v34 = vmul.f32 %v3094_v27, %v3094_v27 }
  0xfd   : > { %v3103_v30 = vsub.f32 %v2740_v42, %v516_v18  ;;  %v3106_v35 = vsub.f32 %v2743_v43, %v548_v41  ;;  %v747_v48 = vsel %vm301_vm0, %v643_v60, 0.0  ;;  %v843_v56 = vsel %vm301_vm0, %v675_v34, 0.0 }
  0xfe   : > { %841 = vadd.xlane.f32.xlu1 %v840_v52  ;;  %748 = vadd.xlane.f32.xlu0 %v747_v48  ;;  %v370_v10 = vpop.xlane.xlu0 %369  ;;  %v466_v24 = vpop.xlane.xlu1 %465 }
  0xff   : > { %v517_v26 = vmul.f32 0.125, %v370_v10  ;;  %v549_v44 = vmul.f32 0.125, %v466_v24  ;;  %v644_v3 = vmul.f32 %v3103_v30, %v3103_v30  ;;  %v676_v42 = vmul.f32 %v3106_v35, %v3106_v35 }
 0x101   : > { %v3115_v15 = vsub.f32 %v2750_v50, %v517_v26  ;;  %v3118_v43 = vsub.f32 %v2753_v51, %v549_v44  ;;  %v750_v52 = vsel %vm301_vm0, %v644_v3, 0.0  ;;  %v846_v60 = vsel %vm301_vm0, %v676_v42, 0.0 }
 0x102   : > { %844 = vadd.xlane.f32.xlu1 %v843_v56  ;;  %751 = vadd.xlane.f32.xlu0 %v750_v52  ;;  %v373_v18 = vpop.xlane.xlu0 %372  ;;  %v469_v41 = vpop.xlane.xlu1 %468 }
 0x103   : > { %3698 = vst [vmem:[#allocation17_spill] sm:$0xff] %v3118_v43  ;;  %v518_v34 = vmul.f32 0.125, %v373_v18  ;;  %v550_v48 = vmul.f32 0.125, %v469_v41  ;;  %v645_v10 = vmul.f32 %v3115_v15, %v3115_v15  ;;  %v677_v50 = vmul.f32 %v3118_v43, %v3118_v43 }
 0x105   : > { %v3127_v24 = vsub.f32 %v2760_v58, %v518_v34  ;;  %v3130_v51 = vsub.f32 %v2763_v59, %v550_v48  ;;  %v753_v56 = vsel %vm301_vm0, %v645_v10, 0.0  ;;  %v849_v3 = vsel %vm301_vm0, %v677_v50, 0.0 }
 0x106   : > { %847 = vadd.xlane.f32.xlu1 %v846_v60  ;;  %754 = vadd.xlane.f32.xlu0 %v753_v56  ;;  %v376_v26 = vpop.xlane.xlu0 %375  ;;  %v472_v44 = vpop.xlane.xlu1 %471 }
 0x107   : > { %3699 = vst [vmem:[#allocation18_spill] sm:$0xff] %v3127_v24  ;;  %3700 = vst [vmem:[#allocation19_spill] sm:$0xff] %v3130_v51  ;;  %v519_v42 = vmul.f32 0.125, %v376_v26  ;;  %v551_v52 = vmul.f32 0.125, %v472_v44  ;;  %v646_v18 = vmul.f32 %v3127_v24, %v3127_v24  ;;  %v678_v58 = vmul.f32 %v3130_v51, %v3130_v51  ;;  %v3703_v44 = vld [vmem:[#allocation2_spill] sm:$0xff] }
 0x109   : > { %v3139_v41 = vsub.f32 %v2770_v6, %v519_v42  ;;  %v3142_v59 = vsub.f32 %v2773_v7, %v551_v52  ;;  %v756_v60 = vsel %vm301_vm0, %v646_v18, 0.0  ;;  %v852_v10 = vsel %vm301_vm0, %v678_v58, 0.0  ;;  %v3705_v7 = vld [vmem:[#allocation3_spill] sm:$0xff] }
 0x10a   : > { %850 = vadd.xlane.f32.xlu1 %v849_v3  ;;  %757 = vadd.xlane.f32.xlu0 %v756_v60  ;;  %v379_v34 = vpop.xlane.xlu0 %378  ;;  %v475_v48 = vpop.xlane.xlu1 %474 }
 0x10b   : > { %3701 = vst [vmem:[#allocation20_spill] sm:$0xff] %v3139_v41  ;;  %3702 = vst [vmem:[#allocation21_spill] sm:$0xff] %v3142_v59  ;;  %v520_v50 = vmul.f32 0.125, %v379_v34  ;;  %v552_v56 = vmul.f32 0.125, %v475_v48  ;;  %v647_v26 = vmul.f32 %v3139_v41, %v3139_v41  ;;  %v679_v6 = vmul.f32 %v3142_v59, %v3142_v59 }
 0x10d   : > { %v3151_v42 = vsub.f32 %v3703_v44, %v520_v50  ;;  %v3154_v52 = vsub.f32 %v3705_v7, %v552_v56  ;;  %v759_v3 = vsel %vm301_vm0, %v647_v26, 0.0  ;;  %v855_v60 = vsel %vm301_vm0, %v679_v6, 0.0  ;;  %v3707_v44 = vld [vmem:[#allocation4_spill] sm:$0xff]  ;;  %v3709_v56 = vld [vmem:[#allocation5_spill] sm:$0xff] }
 0x10e   : > { %853 = vadd.xlane.f32.xlu1 %v852_v10  ;;  %760 = vadd.xlane.f32.xlu0 %v759_v3  ;;  %v382_v18 = vpop.xlane.xlu0 %381  ;;  %v478_v58 = vpop.xlane.xlu1 %477 }
 0x10f   : > { %3704 = vst [vmem:[#allocation2_spill] sm:$0xff] %v3151_v42  ;;  %3706 = vst [vmem:[#allocation3_spill] sm:$0xff] %v3154_v52  ;;  %v521_v34 = vmul.f32 0.125, %v382_v18  ;;  %v553_v48 = vmul.f32 0.125, %v478_v58  ;;  %v648_v41 = vmul.f32 %v3151_v42, %v3151_v42  ;;  %v680_v50 = vmul.f32 %v3154_v52, %v3154_v52 }
 0x111   : > { %v3163_v59 = vsub.f32 %v3707_v44, %v521_v34  ;;  %v3166_v7 = vsub.f32 %v3709_v56, %v553_v48  ;;  %v762_v10 = vsel %vm301_vm0, %v648_v41, 0.0  ;;  %v858_v3 = vsel %vm301_vm0, %v680_v50, 0.0  ;;  %v3711_v44 = vld [vmem:[#allocation6_spill] sm:$0xff]  ;;  %v3713_v48 = vld [vmem:[#allocation7_spill] sm:$0xff] }
 0x112   : > { %856 = vadd.xlane.f32.xlu1 %v855_v60  ;;  %763 = vadd.xlane.f32.xlu0 %v762_v10  ;;  %v385_v26 = vpop.xlane.xlu0 %384  ;;  %v481_v6 = vpop.xlane.xlu1 %480 }
 0x113   : > { %3708 = vst [vmem:[#allocation4_spill] sm:$0xff] %v3163_v59  ;;  %3710 = vst [vmem:[#allocation5_spill] sm:$0xff] %v3166_v7  ;;  %v522_v18 = vmul.f32 0.125, %v385_v26  ;;  %v554_v58 = vmul.f32 0.125, %v481_v6  ;;  %v649_v42 = vmul.f32 %v3163_v59, %v3163_v59  ;;  %v681_v34 = vmul.f32 %v3166_v7, %v3166_v7 }
 0x115   : > { %v3175_v52 = vsub.f32 %v3711_v44, %v522_v18  ;;  %v3178_v56 = vsub.f32 %v3713_v48, %v554_v58  ;;  %v765_v41 = vsel %vm301_vm0, %v649_v42, 0.0  ;;  %v861_v10 = vsel %vm301_vm0, %v681_v34, 0.0  ;;  %v3715_v44 = vld [vmem:[#allocation8_spill] sm:$0xff]  ;;  %v3717_v58 = vld [vmem:[#allocation9_spill] sm:$0xff] }
 0x116   : > { %859 = vadd.xlane.f32.xlu1 %v858_v3  ;;  %766 = vadd.xlane.f32.xlu0 %v765_v41  ;;  %v388_v60 = vpop.xlane.xlu0 %387  ;;  %v484_v50 = vpop.xlane.xlu1 %483 }
 0x117   : > { %3712 = vst [vmem:[#allocation6_spill] sm:$0xff] %v3175_v52  ;;  %3714 = vst [vmem:[#allocation7_spill] sm:$0xff] %v3178_v56  ;;  %v523_v26 = vmul.f32 0.125, %v388_v60  ;;  %v555_v6 = vmul.f32 0.125, %v484_v50  ;;  %v650_v59 = vmul.f32 %v3175_v52, %v3175_v52  ;;  %v682_v18 = vmul.f32 %v3178_v56, %v3178_v56 }
 0x119   : > { %v3187_v7 = vsub.f32 %v3715_v44, %v523_v26  ;;  %v3190_v48 = vsub.f32 %v3717_v58, %v555_v6  ;;  %v768_v42 = vsel %vm301_vm0, %v650_v59, 0.0  ;;  %v864_v41 = vsel %vm301_vm0, %v682_v18, 0.0  ;;  %v3719_v44 = vld [vmem:[#allocation10_spill] sm:$0xff]  ;;  %v3721_v6 = vld [vmem:[#allocation11_spill] sm:$0xff] }
 0x11a   : > { %862 = vadd.xlane.f32.xlu1 %v861_v10  ;;  %769 = vadd.xlane.f32.xlu0 %v768_v42  ;;  %v391_v3 = vpop.xlane.xlu0 %390  ;;  %v487_v34 = vpop.xlane.xlu1 %486 }
 0x11b   : > { %3716 = vst [vmem:[#allocation8_spill] sm:$0xff] %v3187_v7  ;;  %3718 = vst [vmem:[#allocation9_spill] sm:$0xff] %v3190_v48  ;;  %v524_v60 = vmul.f32 0.125, %v391_v3  ;;  %v556_v50 = vmul.f32 0.125, %v487_v34  ;;  %v651_v52 = vmul.f32 %v3187_v7, %v3187_v7  ;;  %v683_v26 = vmul.f32 %v3190_v48, %v3190_v48 }
 0x11d   : > { %v3199_v56 = vsub.f32 %v3719_v44, %v524_v60  ;;  %v3202_v58 = vsub.f32 %v3721_v6, %v556_v50  ;;  %v771_v59 = vsel %vm301_vm0, %v651_v52, 0.0  ;;  %v867_v42 = vsel %vm301_vm0, %v683_v26, 0.0  ;;  %v3723_v44 = vld [vmem:[#allocation12_spill] sm:$0xff]  ;;  %v3725_v50 = vld [vmem:[#allocation13_spill] sm:$0xff] }
 0x11e   : > { %865 = vadd.xlane.f32.xlu1 %v864_v41  ;;  %772 = vadd.xlane.f32.xlu0 %v771_v59  ;;  %v394_v10 = vpop.xlane.xlu0 %393  ;;  %v490_v18 = vpop.xlane.xlu1 %489 }
 0x11f   : > { %3720 = vst [vmem:[#allocation10_spill] sm:$0xff] %v3199_v56  ;;  %3722 = vst [vmem:[#allocation11_spill] sm:$0xff] %v3202_v58  ;;  %v525_v3 = vmul.f32 0.125, %v394_v10  ;;  %v557_v34 = vmul.f32 0.125, %v490_v18  ;;  %v652_v7 = vmul.f32 %v3199_v56, %v3199_v56  ;;  %v684_v60 = vmul.f32 %v3202_v58, %v3202_v58 }
 0x121   : > { %v3211_v48 = vsub.f32 %v3723_v44, %v525_v3  ;;  %v3214_v6 = vsub.f32 %v3725_v50, %v557_v34  ;;  %v774_v52 = vsel %vm301_vm0, %v652_v7, 0.0  ;;  %v870_v59 = vsel %vm301_vm0, %v684_v60, 0.0  ;;  %v3727_v44 = vld [vmem:[#allocation14_spill] sm:$0xff] }
 0x122   : > { %868 = vadd.xlane.f32.xlu1 %v867_v42  ;;  %775 = vadd.xlane.f32.xlu0 %v774_v52  ;;  %v397_v41 = vpop.xlane.xlu0 %396  ;;  %v493_v26 = vpop.xlane.xlu1 %492 }
 0x123   : > { %3724 = vst [vmem:[#allocation12_spill] sm:$0xff] %v3211_v48  ;;  %3726 = vst [vmem:[#allocation13_spill] sm:$0xff] %v3214_v6  ;;  %v526_v10 = vmul.f32 0.125, %v397_v41  ;;  %v558_v18 = vmul.f32 0.125, %v493_v26  ;;  %v653_v56 = vmul.f32 %v3211_v48, %v3211_v48  ;;  %v685_v3 = vmul.f32 %v3214_v6, %v3214_v6 }
 0x125   : > { %v3223_v58 = vsub.f32 %v3727_v44, %v526_v10  ;;  %v3226_v34 = vsub.f32 %v2843_v31, %v558_v18  ;;  %v777_v7 = vsel %vm301_vm0, %v653_v56, 0.0  ;;  %v873_v42 = vsel %vm301_vm0, %v685_v3, 0.0 }
 0x126   : > { %871 = vadd.xlane.f32.xlu1 %v870_v59  ;;  %778 = vadd.xlane.f32.xlu0 %v777_v7 }
 0x127   : > { %3728 = vst [vmem:[#allocation14_spill] sm:$0xff] %v3223_v58  ;;  %3729 = vst [vmem:[#allocation22_spill] sm:$0xff] %v3226_v34  ;;  %v654_v60 = vmul.f32 %v3223_v58, %v3223_v58  ;;  %v686_v50 = vmul.f32 %v3226_v34, %v3226_v34 }
 0x129   : > { %v780_v52 = vsel %vm301_vm0, %v654_v60, 0.0  ;;  %v876_v41 = vsel %vm301_vm0, %v686_v50, 0.0 }
 0x12a   : > { %874 = vadd.xlane.f32.xlu1 %v873_v42  ;;  %781 = vadd.xlane.f32.xlu0 %v780_v52 }
 0x12e   : > { %877 = vadd.xlane.f32.xlu1 %v876_v41 }
 0x13b   : > { %v689_v31 = vpop.xlane.xlu0 %688 }
 0x13c   : > { %v879_v26 = vmul.f32 0.125, %v689_v31 }
 0x13e   : > { %v943_v56 = vadd.f32 1e-05, %v879_v26 }
 0x13f   : > { %v785_v59 = vpop.xlane.xlu1 %784  ;;  %v692_v10 = vpop.xlane.xlu0 %691 }
 0x140   : > { %2294 = vrsqrt.f32 %v943_v56  ;;  %v911_v18 = vmul.f32 0.125, %v785_v59  ;;  %v880_v3 = vmul.f32 0.125, %v692_v10  ;;  %v3239_v10 = vld [vmem:[%s3645_s1] ss:$0 sm:$0xff] }
 0x142   : > { %v975_v44 = vadd.f32 1e-05, %v911_v18  ;;  %v944_v7 = vadd.f32 1e-05, %v880_v3 }
 0x143   : > { %v788_v58 = vpop.xlane.xlu1 %787  ;;  %v695_v6 = vpop.xlane.xlu0 %694 }
 0x144   : > { %2296 = vrsqrt.f32 %v975_v44  ;;  %v912_v34 = vmul.f32 0.125, %v788_v58  ;;  %v881_v60 = vmul.f32 0.125, %v695_v6  ;;  %v3245_v44 = vld [vmem:[%s3646_s2] ss:$0 sm:$0xff] }
 0x145   : > { %2298 = vrsqrt.f32 %v944_v7 }
 0x146   : > { %v976_v42 = vadd.f32 1e-05, %v912_v34  ;;  %v945_v52 = vadd.f32 1e-05, %v881_v60 }
 0x147   : > { %v791_v50 = vpop.xlane.xlu1 %790  ;;  %v698_v41 = vpop.xlane.xlu0 %697 }
 0x148   : > { %2300 = vrsqrt.f32 %v976_v42  ;;  %v913_v31 = vmul.f32 0.125, %v791_v50  ;;  %v882_v26 = vmul.f32 0.125, %v698_v41 }
 0x149   : > { %2302 = vrsqrt.f32 %v945_v52 }
 0x14a   : > { %v2295_v48 = vpop.eup %2294  ;;  %v977_v56 = vadd.f32 1e-05, %v913_v31  ;;  %v946_v59 = vadd.f32 1e-05, %v882_v26 }
 0x14b   : > { %v794_v18 = vpop.xlane.xlu1 %793  ;;  %v701_v58 = vpop.xlane.xlu0 %700  ;;  %v1072_v6 = vmul.f32 %v2295_v48, %v2850_v54 }
 0x14c   : > { %2304 = vrsqrt.f32 %v977_v56  ;;  %v914_v34 = vmul.f32 0.125, %v794_v18  ;;  %v883_v3 = vmul.f32 0.125, %v701_v58  ;;  %v3730_v18 = vld [vmem:[#allocation15_spill] sm:$0xff] }
 0x14d   : > { %2306 = vrsqrt.f32 %v946_v59  ;;  %v1142_v7 = vmul.f32 %v3239_v10, %v1072_v6 }
 0x14e   : > { %v2297_v60 = vpop.eup %2296  ;;  %v978_v42 = vadd.f32 1e-05, %v914_v34  ;;  %v947_v52 = vadd.f32 1e-05, %v883_v3 }
 0x14f   : > { %v2299_v50 = vpop.eup %2298  ;;  %v797_v41 = vpop.xlane.xlu1 %796  ;;  %v1213_v26 = vadd.f32 %v3245_v44, %v1142_v7  ;;  %v1104_v54 = vmul.f32 %v2297_v60, %v2860_v47 }
 0x150   : > { %v704_v31 = vpop.xlane.xlu0 %703  ;;  %2308 = vrsqrt.f32 %v978_v42  ;;  %v915_v48 = vmul.f32 0.125, %v797_v41  ;;  %v1073_v58 = vmul.f32 %v2299_v50, %v3730_v18 }
 0x151   : > { %v884_v56 = vmul.f32 0.125, %v704_v31  ;;  %2310 = vrsqrt.f32 %v947_v52  ;;  %2156 = vmatprep.mubr.msk.f32.mxu0 %vm301_vm0, %v1213_v26  ;;  %v1174_v59 = vmul.f32 %v3239_v10, %v1104_v54 }
 0x152   : > { %v2301_v6 = vpop.eup %2300  ;;  %v979_v34 = vadd.f32 1e-05, %v915_v48  ;;  %v1143_v51 = vmul.f32 %v3239_v10, %v1073_v58 }
 0x153   : > { %v948_v3 = vadd.f32 1e-05, %v884_v56  ;;  %v2303_v24 = vpop.eup %2302  ;;  %v800_v43 = vpop.xlane.xlu1 %799  ;;  %v1245_v47 = vadd.f32 %v3245_v44, %v1174_v59  ;;  %v1105_v60 = vmul.f32 %v2301_v6, %v2863_v55 }
 0x154   : > { %v707_v7 = vpop.xlane.xlu0 %706  ;;  %2312 = vrsqrt.f32 %v979_v34  ;;  %v916_v42 = vmul.f32 0.125, %v800_v43  ;;  %v1214_v52 = vadd.f32 %v3245_v44, %v1143_v51  ;;  %v1074_v41 = vmul.f32 %v2303_v24, %v2872_v2 }
 0x155   : > { %v885_v50 = vmul.f32 0.125, %v707_v7  ;;  %2314 = vrsqrt.f32 %v948_v3  ;;  %2204 = vmatprep.mubr.msk.f32.mxu1 %vm301_vm0, %v1245_v47  ;;  %v1175_v31 = vmul.f32 %v3239_v10, %v1105_v60 }
 0x156   : > { %v2305_v26 = vpop.eup %2304  ;;  %v980_v54 = vadd.f32 1e-05, %v916_v42  ;;  %2157 = vmatmul.mubr.msk.f32.vlgmr.msra.gmra.mrb[0].mxu0 %vm301_vm0, %v1214_v52  ;;  %v1144_v43 = vmul.f32 %v3239_v10, %v1074_v41 }
 0x157   : > { %v949_v48 = vadd.f32 1e-05, %v885_v50  ;;  %v2307_v56 = vpop.eup %2306  ;;  %v803_v18 = vpop.xlane.xlu1 %802  ;;  %v1246_v58 = vadd.f32 %v3245_v44, %v1175_v31  ;;  %v1106_v51 = vmul.f32 %v2305_v26, %v2875_v5 }
 0x158   : > { %v710_v55 = vpop.xlane.xlu0 %709  ;;  %2316 = vrsqrt.f32 %v980_v54  ;;  %v917_v59 = vmul.f32 0.125, %v803_v18  ;;  %v1075_v2 = vmul.f32 %v2307_v56, %v2884_v62  ;;  %v1215_v24 = vadd.f32 %v3245_v44, %v1144_v43 }
 0x159   : > { %v886_v6 = vmul.f32 0.125, %v710_v55  ;;  %2318 = vrsqrt.f32 %v949_v48  ;;  %2205 = vmatmul.mubr.msk.f32.vlgmr.msra.gmra.mrb[0].mxu1 %vm301_vm0, %v1246_v58  ;;  %v1176_v34 = vmul.f32 %v3239_v10, %v1106_v51 }
 0x15a   : > { %v2309_v3 = vpop.eup %2308  ;;  %v981_v7 = vadd.f32 1e-05, %v917_v59  ;;  %v1145_v60 = vmul.f32 %v3239_v10, %v1075_v2  ;;  %2159 = vmatprep.mubr.msk.f32.mxu0 %vm301_vm0, %v1215_v24 }
 0x15b   : > { %v950_v47 = vadd.f32 1e-05, %v886_v6  ;;  %v2311_v42 = vpop.eup %2310  ;;  %v806_v5 = vpop.xlane.xlu1 %805  ;;  %v1247_v52 = vadd.f32 %v3245_v44, %v1176_v34  ;;  %v1107_v62 = vmul.f32 %v2309_v3, %v2887_v9 }
 0x15c   : > { %v713_v50 = vpop.xlane.xlu0 %712  ;;  %2320 = vrsqrt.f32 %v981_v7  ;;  %v918_v41 = vmul.f32 0.125, %v806_v5  ;;  %v1216_v26 = vadd.f32 %v3245_v44, %v1145_v60  ;;  %v1076_v54 = vmul.f32 %v2311_v42, %v2896_v0 }
 0x15d   : > { %v887_v31 = vmul.f32 0.125, %v713_v50  ;;  %2322 = vrsqrt.f32 %v950_v47  ;;  %2207 = vmatprep.mubr.msk.f32.mxu1 %vm301_vm0, %v1247_v52  ;;  %v1177_v48 = vmul.f32 %v3239_v10, %v1107_v62 }
 0x15e   : > { %v2313_v56 = vpop.eup %2312  ;;  %v982_v18 = vadd.f32 1e-05, %v918_v41  ;;  %2160 = vmatmul.mubr.msk.f32.gmra.mrb[2].mxu0 %vm301_vm0, %v1216_v26  ;;  %v1146_v51 = vmul.f32 %v3239_v10, %v1076_v54 }
 0x15f   : > { %v951_v55 = vadd.f32 1e-05, %v887_v31  ;;  %v2315_v43 = vpop.eup %2314  ;;  %v809_v58 = vpop.xlane.xlu1 %808  ;;  %v1248_v59 = vadd.f32 %v3245_v44, %v1177_v48  ;;  %v1108_v6 = vmul.f32 %v2313_v56, %v2899_v13 }
 0x160   : > { %v716_v9 = vpop.xlane.xlu0 %715  ;;  %2324 = vrsqrt.f32 %v982_v18  ;;  %v919_v2 = vmul.f32 0.125, %v809_v58  ;;  %v1077_v0 = vmul.f32 %v2315_v43, %v2908_v22  ;;  %v1217_v34 = vadd.f32 %v3245_v44, %v1146_v51 }
 0x161   : > { %v888_v24 = vmul.f32 0.125, %v716_v9  ;;  %2326 = vrsqrt.f32 %v951_v55  ;;  %2208 = vmatmul.mubr.msk.f32.gmra.mrb[2].mxu1 %vm301_vm0, %v1248_v59  ;;  %v1178_v3 = vmul.f32 %v3239_v10, %v1108_v6 }
 0x162   : > { %v2317_v7 = vpop.eup %2316  ;;  %v983_v47 = vadd.f32 1e-05, %v919_v2  ;;  %v1147_v42 = vmul.f32 %v3239_v10, %v1077_v0  ;;  %2162 = vmatprep.mubr.msk.f32.mxu0 %vm301_vm0, %v1217_v34 }
 0x163   : > { %v952_v60 = vadd.f32 1e-05, %v888_v24  ;;  %v2319_v5 = vpop.eup %2318  ;;  %v812_v13 = vpop.xlane.xlu1 %811  ;;  %v1249_v52 = vadd.f32 %v3245_v44, %v1178_v3  ;;  %v1109_v22 = vmul.f32 %v2317_v7, %v2911_v17 }
 0x164   : > { %v719_v50 = vpop.xlane.xlu0 %718  ;;  %2328 = vrsqrt.f32 %v983_v47  ;;  %v920_v62 = vmul.f32 0.125, %v812_v13  ;;  %v1218_v31 = vadd.f32 %v3245_v44, %v1147_v42  ;;  %v1078_v26 = vmul.f32 %v2319_v5, %v2920_v63 }
 0x165   : > { %v889_v41 = vmul.f32 0.125, %v719_v50  ;;  %2330 = vrsqrt.f32 %v952_v60  ;;  %2210 = vmatprep.mubr.msk.f32.mxu1 %vm301_vm0, %v1249_v52  ;;  %v1179_v54 = vmul.f32 %v3239_v10, %v1109_v22 }
 0x166   : > { %v2321_v48 = vpop.eup %2320  ;;  %v984_v56 = vadd.f32 1e-05, %v920_v62  ;;  %2163 = vmatmul.mubr.msk.f32.gmra.mrb[4].mxu0 %vm301_vm0, %v1218_v31  ;;  %v1148_v58 = vmul.f32 %v3239_v10, %v1078_v26 }
 0x167   : > { %v953_v18 = vadd.f32 1e-05, %v889_v41  ;;  %v2323_v55 = vpop.eup %2322  ;;  %v815_v43 = vpop.xlane.xlu1 %814  ;;  %v1250_v9 = vadd.f32 %v3245_v44, %v1179_v54  ;;  %v1110_v51 = vmul.f32 %v2321_v48, %v2923_v21 }
 0x168   : > { %v722_v17 = vpop.xlane.xlu0 %721  ;;  %2332 = vrsqrt.f32 %v984_v56  ;;  %v921_v59 = vmul.f32 0.125, %v815_v43  ;;  %v1079_v63 = vmul.f32 %v2323_v55, %v2932_v46  ;;  %v1219_v2 = vadd.f32 %v3245_v44, %v1148_v58 }
 0x169   : > { %v890_v6 = vmul.f32 0.125, %v722_v17  ;;  %2334 = vrsqrt.f32 %v953_v18  ;;  %2211 = vmatmul.mubr.msk.f32.gmra.mrb[4].mxu1 %vm301_vm0, %v1250_v9  ;;  %v1180_v24 = vmul.f32 %v3239_v10, %v1110_v51 }
 0x16a   : > { %v2325_v0 = vpop.eup %2324  ;;  %v985_v34 = vadd.f32 1e-05, %v921_v59  ;;  %v1149_v7 = vmul.f32 %v3239_v10, %v1079_v63  ;;  %2165 = vmatprep.mubr.msk.f32.mxu0 %vm301_vm0, %v1219_v2 }
 0x16b   : > { %v954_v3 = vadd.f32 1e-05, %v890_v6  ;;  %v2327_v47 = vpop.eup %2326  ;;  %v818_v21 = vpop.xlane.xlu1 %817  ;;  %v1251_v42 = vadd.f32 %v3245_v44, %v1180_v24  ;;  %v1111_v46 = vmul.f32 %v2325_v0, %v2935_v25 }
 0x16c   : > { %v725_v60 = vpop.xlane.xlu0 %724  ;;  %2336 = vrsqrt.f32 %v985_v34  ;;  %v922_v5 = vmul.f32 0.125, %v818_v21  ;;  %v1220_v50 = vadd.f32 %v3245_v44, %v1149_v7  ;;  %v1080_v52 = vmul.f32 %v2327_v47, %v2944_v14 }
 0x16d   : > { %v891_v13 = vmul.f32 0.125, %v725_v60  ;;  %2338 = vrsqrt.f32 %v954_v3  ;;  %2213 = vmatprep.mubr.msk.f32.mxu1 %vm301_vm0, %v1251_v42  ;;  %v1181_v22 = vmul.f32 %v3239_v10, %v1111_v46 }
 0x16e   : > { %v2329_v62 = vpop.eup %2328  ;;  %v986_v41 = vadd.f32 1e-05, %v922_v5  ;;  %2166 = vmatmul.mubr.msk.f32.gmra.mrb[6].mxu0 %vm301_vm0, %v1220_v50  ;;  %v1150_v48 = vmul.f32 %v3239_v10, %v1080_v52  ;;  %v3731_v52 = vld [vmem:[#allocation16_spill] sm:$0xff] }
 0x16f   : > { %v955_v31 = vadd.f32 1e-05, %v891_v13  ;;  %v2331_v26 = vpop.eup %2330  ;;  %v821_v54 = vpop.xlane.xlu1 %820  ;;  %v1252_v56 = vadd.f32 %v3245_v44, %v1181_v22  ;;  %v1112_v18 = vmul.f32 %v2329_v62, %v2947_v29 }
 0x170   : > { %v728_v25 = vpop.xlane.xlu0 %727  ;;  %2340 = vrsqrt.f32 %v986_v41  ;;  %v923_v55 = vmul.f32 0.125, %v821_v54  ;;  %v1081_v14 = vmul.f32 %v2331_v26, %v2956_v8  ;;  %v1221_v17 = vadd.f32 %v3245_v44, %v1150_v48 }
 0x171   : > { %v892_v43 = vmul.f32 0.125, %v728_v25  ;;  %2342 = vrsqrt.f32 %v955_v31  ;;  %2214 = vmatmul.mubr.msk.f32.gmra.mrb[6].mxu1 %vm301_vm0, %v1252_v56  ;;  %v1182_v58 = vmul.f32 %v3239_v10, %v1112_v18 }
 0x172   : > { %v2333_v9 = vpop.eup %2332  ;;  %v987_v51 = vadd.f32 1e-05, %v923_v55  ;;  %v1151_v6 = vmul.f32 %v3239_v10, %v1081_v14  ;;  %2168 = vmatprep.mubr.msk.f32.mxu0 %vm301_vm0, %v1221_v17 }
 0x173   : > { %v956_v59 = vadd.f32 1e-05, %v892_v43  ;;  %v2335_v63 = vpop.eup %2334  ;;  %v824_v29 = vpop.xlane.xlu1 %823  ;;  %v1253_v24 = vadd.f32 %v3245_v44, %v1182_v58  ;;  %v1113_v8 = vmul.f32 %v2333_v9, %v2959_v33 }
 0x174   : > { %v731_v2 = vpop.xlane.xlu0 %730  ;;  %2344 = vrsqrt.f32 %v987_v51  ;;  %v924_v0 = vmul.f32 0.125, %v824_v29  ;;  %v1222_v3 = vadd.f32 %v3245_v44, %v1151_v6  ;;  %v1082_v7 = vmul.f32 %v2335_v63, %v2968_v12 }
 0x175   : > { %v893_v34 = vmul.f32 0.125, %v731_v2  ;;  %2346 = vrsqrt.f32 %v956_v59  ;;  %2216 = vmatprep.mubr.msk.f32.mxu1 %vm301_vm0, %v1253_v24  ;;  %v1183_v47 = vmul.f32 %v3239_v10, %v1113_v8 }
 0x176   : > { %v2337_v21 = vpop.eup %2336  ;;  %v988_v60 = vadd.f32 1e-05, %v924_v0  ;;  %2169 = vmatmul.mubr.msk.f32.gmra.mrb[8].mxu0 %vm301_vm0, %v1222_v3  ;;  %v1152_v13 = vmul.f32 %v3239_v10, %v1082_v7 }
 0x177   : > { %v957_v42 = vadd.f32 1e-05, %v893_v34  ;;  %v2339_v46 = vpop.eup %2338  ;;  %v827_v5 = vpop.xlane.xlu1 %826  ;;  %v1254_v50 = vadd.f32 %v3245_v44, %v1183_v47  ;;  %v1114_v22 = vmul.f32 %v2337_v21, %v3731_v52 }
 0x178   : > { %v734_v33 = vpop.xlane.xlu0 %733  ;;  %2348 = vrsqrt.f32 %v988_v60  ;;  %v925_v62 = vmul.f32 0.125, %v827_v5  ;;  %v1083_v12 = vmul.f32 %v2339_v46, %v2983_v28  ;;  %v1223_v31 = vadd.f32 %v3245_v44, %v1152_v13 }
 0x179   : > { %v894_v41 = vmul.f32 0.125, %v734_v33  ;;  %2350 = vrsqrt.f32 %v957_v42  ;;  %2217 = vmatmul.mubr.msk.f32.gmra.mrb[8].mxu1 %vm301_vm0, %v1254_v50  ;;  %v1184_v26 = vmul.f32 %v3239_v10, %v1114_v22 }
 0x17a   : > { %v2341_v54 = vpop.eup %2340  ;;  %v989_v25 = vadd.f32 1e-05, %v925_v62  ;;  %v1153_v56 = vmul.f32 %v3239_v10, %v1083_v12  ;;  %2171 = vmatprep.mubr.msk.f32.mxu0 %vm301_vm0, %v1223_v31 }
 0x17b   : > { %v958_v48 = vadd.f32 1e-05, %v894_v41  ;;  %v2343_v18 = vpop.eup %2342  ;;  %v830_v55 = vpop.xlane.xlu1 %829  ;;  %v1255_v14 = vadd.f32 %v3245_v44, %v1184_v26  ;;  %v1115_v28 = vmul.f32 %v2341_v54, %v2986_v16 }
 0x17c   : > { %v737_v43 = vpop.xlane.xlu0 %736  ;;  %2352 = vrsqrt.f32 %v989_v25  ;;  %v926_v17 = vmul.f32 0.125, %v830_v55  ;;  %v1224_v9 = vadd.f32 %v3245_v44, %v1153_v56  ;;  %v1084_v51 = vmul.f32 %v2343_v18, %v2995_v45 }
 0x17d   : > { %v895_v58 = vmul.f32 0.125, %v737_v43  ;;  %2354 = vrsqrt.f32 %v958_v48  ;;  %2219 = vmatprep.mubr.msk.f32.mxu1 %vm301_vm0, %v1255_v14  ;;  %v1185_v59 = vmul.f32 %v3239_v10, %v1115_v28 }
 0x17e   : > { %v2345_v6 = vpop.eup %2344  ;;  %v990_v63 = vadd.f32 1e-05, %v926_v17  ;;  %2172 = vmatmul.mubr.msk.f32.gmra.mrb[10].mxu0 %vm301_vm0, %v1224_v9  ;;  %v1154_v8 = vmul.f32 %v3239_v10, %v1084_v51 }
 0x17f   : > { %v959_v29 = vadd.f32 1e-05, %v895_v58  ;;  %v2347_v2 = vpop.eup %2346  ;;  %v833_v24 = vpop.xlane.xlu1 %832  ;;  %v1256_v0 = vadd.f32 %v3245_v44, %v1185_v59  ;;  %v1116_v34 = vmul.f32 %v2345_v6, %v2998_v20 }
 0x180   : > { %v740_v16 = vpop.xlane.xlu0 %739  ;;  %2356 = vrsqrt.f32 %v990_v63  ;;  %v927_v3 = vmul.f32 0.125, %v833_v24  ;;  %v1085_v45 = vmul.f32 %v2347_v2, %v3007_v36  ;;  %v1225_v47 = vadd.f32 %v3245_v44, %v1154_v8 }
 0x181   : > { %v896_v7 = vmul.f32 0.125, %v740_v16  ;;  %2358 = vrsqrt.f32 %v959_v29  ;;  %2220 = vmatmul.mubr.msk.f32.gmra.mrb[10].mxu1 %vm301_vm0, %v1256_v0  ;;  %v1186_v21 = vmul.f32 %v3239_v10, %v1116_v34 }
 0x182   : > { %v2349_v60 = vpop.eup %2348  ;;  %v991_v42 = vadd.f32 1e-05, %v927_v3  ;;  %v1155_v5 = vmul.f32 %v3239_v10, %v1085_v45  ;;  %2174 = vmatprep.mubr.msk.f32.mxu0 %vm301_vm0, %v1225_v47 }
 0x183   : > { %v960_v46 = vadd.f32 1e-05, %v896_v7  ;;  %v2351_v33 = vpop.eup %2350  ;;  %v836_v20 = vpop.xlane.xlu1 %835  ;;  %v1257_v50 = vadd.f32 %v3245_v44, %v1186_v21  ;;  %v1117_v36 = vmul.f32 %v2349_v60, %v3010_v49 }
 0x184   : > { %v743_v13 = vpop.xlane.xlu0 %742  ;;  %2360 = vrsqrt.f32 %v991_v42  ;;  %v928_v52 = vmul.f32 0.125, %v836_v20  ;;  %v1226_v62 = vadd.f32 %v3245_v44, %v1155_v5  ;;  %v1086_v41 = vmul.f32 %v2351_v33, %v3019_v38 }
 0x185   : > { %v897_v22 = vmul.f32 0.125, %v743_v13  ;;  %2362 = vrsqrt.f32 %v960_v46  ;;  %2222 = vmatprep.mubr.msk.f32.mxu1 %vm301_vm0, %v1257_v50  ;;  %v1187_v12 = vmul.f32 %v3239_v10, %v1117_v36 }
 0x186   : > { %v2353_v31 = vpop.eup %2352  ;;  %v992_v26 = vadd.f32 1e-05, %v928_v52  ;;  %2175 = vmatmul.mubr.msk.f32.gmra.mrb[12].mxu0 %vm301_vm0, %v1226_v62  ;;  %v1156_v56 = vmul.f32 %v3239_v10, %v1086_v41 }
 0x187   : > { %v961_v54 = vadd.f32 1e-05, %v897_v22  ;;  %v2355_v25 = vpop.eup %2354  ;;  %v839_v48 = vpop.xlane.xlu1 %838  ;;  %v1258_v18 = vadd.f32 %v3245_v44, %v1187_v12  ;;  %v1118_v55 = vmul.f32 %v2353_v31, %v3022_v53 }
 0x188   : > { %v746_v49 = vpop.xlane.xlu0 %745  ;;  %2364 = vrsqrt.f32 %v992_v26  ;;  %v929_v43 = vmul.f32 0.125, %v839_v48  ;;  %v1087_v38 = vmul.f32 %v2355_v25, %v3031_v1  ;;  %v1227_v28 = vadd.f32 %v3245_v44, %v1156_v56 }
 0x189   : > { %v898_v14 = vmul.f32 0.125, %v746_v49  ;;  %2366 = vrsqrt.f32 %v961_v54  ;;  %2223 = vmatmul.mubr.msk.f32.gmra.mrb[12].mxu1 %vm301_vm0, %v1258_v18  ;;  %v1188_v17 = vmul.f32 %v3239_v10, %v1118_v55 }
 0x18a   : > { %v2357_v58 = vpop.eup %2356  ;;  %v993_v9 = vadd.f32 1e-05, %v929_v43  ;;  %v1157_v59 = vmul.f32 %v3239_v10, %v1087_v38  ;;  %2177 = vmatprep.mubr.msk.f32.mxu0 %vm301_vm0, %v1227_v28 }
 0x18b   : > { %v962_v51 = vadd.f32 1e-05, %v898_v14  ;;  %v2359_v6 = vpop.eup %2358  ;;  %v842_v53 = vpop.xlane.xlu1 %841  ;;  %v1259_v29 = vadd.f32 %v3245_v44, %v1188_v17  ;;  %v1119_v1 = vmul.f32 %v2357_v58, %v3034_v57 }
 0x18c   : > { %v749_v63 = vpop.xlane.xlu0 %748  ;;  %2368 = vrsqrt.f32 %v993_v9  ;;  %v930_v2 = vmul.f32 0.125, %v842_v53  ;;  %v1228_v16 = vadd.f32 %v3245_v44, %v1157_v59  ;;  %v1088_v8 = vmul.f32 %v2359_v6, %v3043_v23 }
 0x18d   : > { %v899_v24 = vmul.f32 0.125, %v749_v63  ;;  %2370 = vrsqrt.f32 %v962_v51  ;;  %2225 = vmatprep.mubr.msk.f32.mxu1 %vm301_vm0, %v1259_v29  ;;  %v1189_v0 = vmul.f32 %v3239_v10, %v1119_v1 }
 0x18e   : > { %v2361_v34 = vpop.eup %2360  ;;  %v994_v3 = vadd.f32 1e-05, %v930_v2  ;;  %2178 = vmatmul.mubr.msk.f32.gmra.mrb[14].mxu0 %vm301_vm0, %v1228_v16  ;;  %v1158_v21 = vmul.f32 %v3239_v10, %v1088_v8 }
 0x18f   : > { %v963_v7 = vadd.f32 1e-05, %v899_v24  ;;  %v2363_v45 = vpop.eup %2362  ;;  %v845_v47 = vpop.xlane.xlu1 %844  ;;  %v1260_v60 = vadd.f32 %v3245_v44, %v1189_v0  ;;  %v1120_v42 = vmul.f32 %v2361_v34, %v3046_v61 }
 0x190   : > { %v752_v57 = vpop.xlane.xlu0 %751  ;;  %2372 = vrsqrt.f32 %v994_v3  ;;  %v931_v46 = vmul.f32 0.125, %v845_v47  ;;  %v1089_v23 = vmul.f32 %v2363_v45, %v3055_v32  ;;  %v1229_v33 = vadd.f32 %v3245_v44, %v1158_v21 }
 0x191   : > { %v900_v5 = vmul.f32 0.125, %v752_v57  ;;  %2374 = vrsqrt.f32 %v963_v7  ;;  %2226 = vmatmul.mubr.msk.f32.gmra.mrb[14].mxu1 %vm301_vm0, %v1260_v60  ;;  %v1190_v20 = vmul.f32 %v3239_v10, %v1120_v42 }
 0x192   : > { %v2365_v13 = vpop.eup %2364  ;;  %v995_v50 = vadd.f32 1e-05, %v931_v46  ;;  %v1159_v52 = vmul.f32 %v3239_v10, %v1089_v23  ;;  %2180 = vmatprep.mubr.msk.f32.mxu0 %vm301_vm0, %v1229_v33 }
 0x193   : > { %v964_v36 = vadd.f32 1e-05, %v900_v5  ;;  %v2367_v22 = vpop.eup %2366  ;;  %v848_v61 = vpop.xlane.xlu1 %847  ;;  %v1261_v41 = vadd.f32 %v3245_v44, %v1190_v20  ;;  %v1121_v32 = vmul.f32 %v2365_v13, %v3058_v4 }
 0x194   : > { %v755_v62 = vpop.xlane.xlu0 %754  ;;  %2376 = vrsqrt.f32 %v995_v50  ;;  %v932_v12 = vmul.f32 0.125, %v848_v61  ;;  %v1230_v26 = vadd.f32 %v3245_v44, %v1159_v52  ;;  %v1090_v54 = vmul.f32 %v2367_v22, %v3067_v37 }
 0x195   : > { %v901_v31 = vmul.f32 0.125, %v755_v62  ;;  %2378 = vrsqrt.f32 %v964_v36  ;;  %2228 = vmatprep.mubr.msk.f32.mxu1 %vm301_vm0, %v1261_v41  ;;  %v1191_v25 = vmul.f32 %v3239_v10, %v1121_v32 }
 0x196   : > { %v2369_v48 = vpop.eup %2368  ;;  %v996_v49 = vadd.f32 1e-05, %v932_v12  ;;  %2181 = vmatmul.mubr.msk.f32.gmra.mrb[16].mxu0 %vm301_vm0, %v1230_v26  ;;  %v1160_v43 = vmul.f32 %v3239_v10, %v1090_v54 }
 0x197   : > { %v965_v56 = vadd.f32 1e-05, %v901_v31  ;;  %v2371_v18 = vpop.eup %2370  ;;  %v851_v55 = vpop.xlane.xlu1 %850  ;;  %v1262_v14 = vadd.f32 %v3245_v44, %v1191_v25  ;;  %v1122_v38 = vmul.f32 %v2369_v48, %v3070_v11 }
 0x198   : > { %v758_v4 = vpop.xlane.xlu0 %757  ;;  %2380 = vrsqrt.f32 %v996_v49  ;;  %v933_v28 = vmul.f32 0.125, %v851_v55  ;;  %v1091_v37 = vmul.f32 %v2371_v18, %v3079_v40  ;;  %v1231_v58 = vadd.f32 %v3245_v44, %v1160_v43  ;;  %v3732_v18 = vld [vmem:[#allocation17_spill] sm:$0xff] }
 0x199   : > { %v902_v17 = vmul.f32 0.125, %v758_v4  ;;  %2382 = vrsqrt.f32 %v965_v56  ;;  %2229 = vmatmul.mubr.msk.f32.gmra.mrb[16].mxu1 %vm301_vm0, %v1262_v14  ;;  %v1192_v9 = vmul.f32 %v3239_v10, %v1122_v38 }
 0x19a   : > { %v2373_v51 = vpop.eup %2372  ;;  %v997_v59 = vadd.f32 1e-05, %v933_v28  ;;  %v1161_v53 = vmul.f32 %v3239_v10, %v1091_v37  ;;  %2183 = vmatprep.mubr.msk.f32.mxu0 %vm301_vm0, %v1231_v58 }
 0x19b   : > { %v966_v6 = vadd.f32 1e-05, %v902_v17  ;;  %v2375_v63 = vpop.eup %2374  ;;  %v854_v11 = vpop.xlane.xlu1 %853  ;;  %v1263_v1 = vadd.f32 %v3245_v44, %v1192_v9  ;;  %v1123_v40 = vmul.f32 %v2373_v51, %v3082_v19 }
 0x19c   : > { %v761_v29 = vpop.xlane.xlu0 %760  ;;  %2384 = vrsqrt.f32 %v997_v59  ;;  %v934_v2 = vmul.f32 0.125, %v854_v11  ;;  %v1232_v16 = vadd.f32 %v3245_v44, %v1161_v53  ;;  %v1092_v8 = vmul.f32 %v2375_v63, %v3091_v39  ;;  %v3734_v63 = vld [vmem:[#allocation19_spill] sm:$0xff] }
 0x19d   : > { %v903_v24 = vmul.f32 0.125, %v761_v29  ;;  %2386 = vrsqrt.f32 %v966_v6  ;;  %2231 = vmatprep.mubr.msk.f32.mxu1 %vm301_vm0, %v1263_v1  ;;  %v1193_v0 = vmul.f32 %v3239_v10, %v1123_v40 }
 0x19e   : > { %v2377_v34 = vpop.eup %2376  ;;  %v998_v3 = vadd.f32 1e-05, %v934_v2  ;;  %2184 = vmatmul.mubr.msk.f32.gmra.mrb[18].mxu0 %vm301_vm0, %v1232_v16  ;;  %v1162_v57 = vmul.f32 %v3239_v10, %v1092_v8  ;;  %v3735_v2 = vld [vmem:[#allocation20_spill] sm:$0xff] }
 0x19f   : > { %v967_v7 = vadd.f32 1e-05, %v903_v24  ;;  %v2379_v45 = vpop.eup %2378  ;;  %v857_v47 = vpop.xlane.xlu1 %856  ;;  %v1264_v21 = vadd.f32 %v3245_v44, %v1193_v0  ;;  %v1124_v60 = vmul.f32 %v2377_v34, %v3094_v27 }
 0x1a0   : > { %v764_v19 = vpop.xlane.xlu0 %763  ;;  %2388 = vrsqrt.f32 %v998_v3  ;;  %v935_v42 = vmul.f32 0.125, %v857_v47  ;;  %v1093_v39 = vmul.f32 %v2379_v45, %v3103_v30  ;;  %v1233_v5 = vadd.f32 %v3245_v44, %v1162_v57  ;;  %v3736_v57 = vld [vmem:[#allocation21_spill] sm:$0xff] }
 0x1a1   : > { %v904_v46 = vmul.f32 0.125, %v764_v19  ;;  %2390 = vrsqrt.f32 %v967_v7  ;;  %2232 = vmatmul.mubr.msk.f32.gmra.mrb[18].mxu1 %vm301_vm0, %v1264_v21  ;;  %v1194_v23 = vmul.f32 %v3239_v10, %v1124_v60 }
 0x1a2   : > { %v2381_v33 = vpop.eup %2380  ;;  %v999_v20 = vadd.f32 1e-05, %v935_v42  ;;  %v1163_v50 = vmul.f32 %v3239_v10, %v1093_v39  ;;  %2186 = vmatprep.mubr.msk.f32.mxu0 %vm301_vm0, %v1233_v5 }
 0x1a3   : > { %v968_v13 = vadd.f32 1e-05, %v904_v46  ;;  %v2383_v36 = vpop.eup %2382  ;;  %v860_v27 = vpop.xlane.xlu1 %859  ;;  %v1265_v22 = vadd.f32 %v3245_v44, %v1194_v23  ;;  %v1125_v30 = vmul.f32 %v2381_v33, %v3106_v35  ;;  %v3737_v46 = vld [vmem:[#allocation2_spill] sm:$0xff] }
 0x1a4   : > { %v767_v52 = vpop.xlane.xlu0 %766  ;;  %2392 = vrsqrt.f32 %v999_v20  ;;  %v936_v61 = vmul.f32 0.125, %v860_v27  ;;  %v1234_v41 = vadd.f32 %v3245_v44, %v1163_v50  ;;  %v1094_v32 = vmul.f32 %v2383_v36, %v3115_v15  ;;  %v3733_v15 = vld [vmem:[#allocation18_spill] sm:$0xff] }
 0x1a5   : > { %v905_v62 = vmul.f32 0.125, %v767_v52  ;;  %2394 = vrsqrt.f32 %v968_v13  ;;  %2234 = vmatprep.mubr.msk.f32.mxu1 %vm301_vm0, %v1265_v22  ;;  %v1195_v12 = vmul.f32 %v3239_v10, %v1125_v30  ;;  %v3738_v30 = vld [vmem:[#allocation3_spill] sm:$0xff] }
 0x1a6   : > { %v2385_v31 = vpop.eup %2384  ;;  %v1000_v26 = vadd.f32 1e-05, %v936_v61  ;;  %2187 = vmatmul.mubr.msk.f32.gmra.mrb[20].mxu0 %vm301_vm0, %v1234_v41  ;;  %v1164_v49 = vmul.f32 %v3239_v10, %v1094_v32 }
 0x1a7   : > { %v969_v54 = vadd.f32 1e-05, %v905_v62  ;;  %v2387_v25 = vpop.eup %2386  ;;  %v863_v48 = vpop.xlane.xlu1 %862  ;;  %v1266_v56 = vadd.f32 %v3245_v44, %v1195_v12  ;;  %v1126_v55 = vmul.f32 %v2385_v31, %v3732_v18  ;;  %v3739_v12 = vld [vmem:[#allocation4_spill] sm:$0xff] }
 0x1a8   : > { %v770_v35 = vpop.xlane.xlu0 %769  ;;  %2396 = vrsqrt.f32 %v1000_v26  ;;  %v937_v4 = vmul.f32 0.125, %v863_v48  ;;  %v1095_v14 = vmul.f32 %v2387_v25, %v3733_v15  ;;  %v1235_v38 = vadd.f32 %v3245_v44, %v1164_v49 }
 0x1a9   : > { %v906_v43 = vmul.f32 0.125, %v770_v35  ;;  %2398 = vrsqrt.f32 %v969_v54  ;;  %2235 = vmatmul.mubr.msk.f32.gmra.mrb[20].mxu1 %vm301_vm0, %v1266_v56  ;;  %v1196_v28 = vmul.f32 %v3239_v10, %v1126_v55 }
 0x1aa   : > { %v2389_v17 = vpop.eup %2388  ;;  %v1001_v37 = vadd.f32 1e-05, %v937_v4  ;;  %v1165_v9 = vmul.f32 %v3239_v10, %v1095_v14  ;;  %2189 = vmatprep.mubr.msk.f32.mxu0 %vm301_vm0, %v1235_v38  ;;  %v3740_v4 = vld [vmem:[#allocation5_spill] sm:$0xff]  ;;  %v3741_v38 = vld [vmem:[#allocation6_spill] sm:$0xff] }
 0x1ab   : > { %v970_v58 = vadd.f32 1e-05, %v906_v43  ;;  %v2391_v51 = vpop.eup %2390  ;;  %v866_v59 = vpop.xlane.xlu1 %865  ;;  %v1267_v53 = vadd.f32 %v3245_v44, %v1196_v28  ;;  %v1127_v11 = vmul.f32 %v2389_v17, %v3734_v63 }
 0x1ac   : > { %v773_v6 = vpop.xlane.xlu0 %772  ;;  %2400 = vrsqrt.f32 %v1001_v37  ;;  %v938_v29 = vmul.f32 0.125, %v866_v59  ;;  %v1236_v40 = vadd.f32 %v3245_v44, %v1165_v9  ;;  %v1096_v24 = vmul.f32 %v2391_v51, %v3735_v2  ;;  %v3743_v2 = vld [vmem:[#allocation8_spill] sm:$0xff] }
 0x1ad   : > { %v907_v1 = vmul.f32 0.125, %v773_v6  ;;  %2402 = vrsqrt.f32 %v970_v58  ;;  %2237 = vmatprep.mubr.msk.f32.mxu1 %vm301_vm0, %v1267_v53  ;;  %v1197_v16 = vmul.f32 %v3239_v10, %v1127_v11  ;;  %v3742_v11 = vld [vmem:[#allocation7_spill] sm:$0xff] }
 0x1ae   : > { %v2393_v8 = vpop.eup %2392  ;;  %v1002_v0 = vadd.f32 1e-05, %v938_v29  ;;  %2190 = vmatmul.mubr.msk.f32.gmra.mrb[22].mxu0 %vm301_vm0, %v1236_v40  ;;  %v1166_v47 = vmul.f32 %v3239_v10, %v1096_v24 }
 0x1af   : > { %v971_v34 = vadd.f32 1e-05, %v907_v1  ;;  %v2395_v3 = vpop.eup %2394  ;;  %v869_v7 = vpop.xlane.xlu1 %868  ;;  %v1268_v19 = vadd.f32 %v3245_v44, %v1197_v16  ;;  %v1128_v21 = vmul.f32 %v2393_v8, %v3736_v57  ;;  %v3745_v57 = vld [vmem:[#allocation10_spill] sm:$0xff] }
 0x1b0   : > { %v776_v45 = vpop.xlane.xlu0 %775  ;;  %2404 = vrsqrt.f32 %v1002_v0  ;;  %v939_v60 = vmul.f32 0.125, %v869_v7  ;;  %v1097_v39 = vmul.f32 %v2395_v3, %v3737_v46  ;;  %v1237_v5 = vadd.f32 %v3245_v44, %v1166_v47 }
 0x1b1   : > { %v908_v42 = vmul.f32 0.125, %v776_v45  ;;  %2406 = vrsqrt.f32 %v971_v34  ;;  %2238 = vmatmul.mubr.msk.f32.gmra.mrb[22].mxu1 %vm301_vm0, %v1268_v19  ;;  %v1198_v23 = vmul.f32 %v3239_v10, %v1128_v21  ;;  %v3744_v45 = vld [vmem:[#allocation9_spill] sm:$0xff] }
 0x1b2   : > { %v2397_v33 = vpop.eup %2396  ;;  %v1003_v20 = vadd.f32 1e-05, %v939_v60  ;;  %v1167_v50 = vmul.f32 %v3239_v10, %v1097_v39  ;;  %2192 = vmatprep.mubr.msk.f32.mxu0 %vm301_vm0, %v1237_v5  ;;  %v2422_v60 = vld [vmem:[%s3645_s1] ss:$0 sm:$0xff] }
 0x1b3   : > { %v972_v13 = vadd.f32 1e-05, %v908_v42  ;;  %v2399_v36 = vpop.eup %2398  ;;  %v872_v27 = vpop.xlane.xlu1 %871  ;;  %v1269_v22 = vadd.f32 %v3245_v44, %v1198_v23  ;;  %v1129_v61 = vmul.f32 %v2397_v33, %v3738_v30  ;;  %v2423_v5 = vld [vmem:[%s3646_s2] ss:$0 sm:$0xff] }
 0x1b4   : > { %v779_v52 = vpop.xlane.xlu0 %778  ;;  %2408 = vrsqrt.f32 %v1003_v20  ;;  %v940_v62 = vmul.f32 0.125, %v872_v27  ;;  %v1238_v32 = vadd.f32 %v3245_v44, %v1167_v50  ;;  %v1098_v31 = vmul.f32 %v2399_v36, %v3739_v12 }
 0x1b5   : > { %v909_v41 = vmul.f32 0.125, %v779_v52  ;;  %2410 = vrsqrt.f32 %v972_v13  ;;  %2240 = vmatprep.mubr.msk.f32.mxu1 %vm301_vm0, %v1269_v22  ;;  %v1199_v26 = vmul.f32 %v3239_v10, %v1129_v61  ;;  %v3747_v13 = vld [vmem:[#allocation12_spill] sm:$0xff]  ;;  %v3748_v61 = vld [vmem:[#allocation13_spill] sm:$0xff] }
 0x1b6   : > { %v2401_v54 = vpop.eup %2400  ;;  %v1004_v25 = vadd.f32 1e-05, %v940_v62  ;;  %2193 = vmatmul.mubr.msk.f32.gmra.mrb[24].mxu0 %vm301_vm0, %v1238_v32  ;;  %v1168_v18 = vmul.f32 %v3239_v10, %v1098_v31  ;;  %v3749_v32 = vld [vmem:[#allocation14_spill] sm:$0xff] }
 0x1b7   : > { %v973_v48 = vadd.f32 1e-05, %v909_v41  ;;  %v2403_v35 = vpop.eup %2402  ;;  %v875_v49 = vpop.xlane.xlu1 %874  ;;  %v1270_v55 = vadd.f32 %v3245_v44, %v1199_v26  ;;  %v1130_v43 = vmul.f32 %v2401_v54, %v3740_v4 }
 0x1b8   : > { %v782_v56 = vpop.xlane.xlu0 %781  ;;  %2412 = vrsqrt.f32 %v1004_v25  ;;  %v941_v15 = vmul.f32 0.125, %v875_v49  ;;  %v1099_v28 = vmul.f32 %v2403_v35, %v3741_v38  ;;  %v1239_v17 = vadd.f32 %v3245_v44, %v1168_v18 }
 0x1b9   : > { %v910_v14 = vmul.f32 0.125, %v782_v56  ;;  %2414 = vrsqrt.f32 %v973_v48  ;;  %2241 = vmatmul.mubr.msk.f32.gmra.mrb[24].mxu1 %vm301_vm0, %v1270_v55  ;;  %v1200_v37 = vmul.f32 %v3239_v10, %v1130_v43  ;;  %v3750_v48 = vld [vmem:[#allocation22_spill] sm:$0xff] }
 0x1ba   : > { %v2405_v58 = vpop.eup %2404  ;;  %v1005_v9 = vadd.f32 1e-05, %v941_v15  ;;  %v1169_v59 = vmul.f32 %v3239_v10, %v1099_v28  ;;  %2195 = vmatprep.mubr.msk.f32.mxu0 %vm301_vm0, %v1239_v17 }
 0x1bb   : > { %v974_v51 = vadd.f32 1e-05, %v910_v14  ;;  %v2407_v6 = vpop.eup %2406  ;;  %v878_v53 = vpop.xlane.xlu1 %877  ;;  %v1271_v63 = vadd.f32 %v3245_v44, %v1200_v37  ;;  %v1131_v29 = vmul.f32 %v2405_v58, %v3742_v11 }
 0x1bc   : > { %2416 = vrsqrt.f32 %v1005_v9  ;;  %v942_v1 = vmul.f32 0.125, %v878_v53  ;;  %v1240_v40 = vadd.f32 %v3245_v44, %v1169_v59  ;;  %v1100_v24 = vmul.f32 %v2407_v6, %v3743_v2 }
 0x1bd   : > { %2418 = vrsqrt.f32 %v974_v51  ;;  %2243 = vmatprep.mubr.msk.f32.mxu1 %vm301_vm0, %v1271_v63  ;;  %v1201_v16 = vmul.f32 %v3239_v10, %v1131_v29 }
 0x1be   : > { %v2409_v8 = vpop.eup %2408  ;;  %v1006_v0 = vadd.f32 1e-05, %v942_v1  ;;  %2196 = vmatmul.mubr.msk.f32.gmra.mrb[26].mxu0 %vm301_vm0, %v1240_v40  ;;  %v1170_v34 = vmul.f32 %v3239_v10, %v1100_v24 }
 0x1bf   : > { %v2411_v3 = vpop.eup %2410  ;;  %v1272_v7 = vadd.f32 %v3245_v44, %v1201_v16  ;;  %v1132_v47 = vmul.f32 %v2409_v8, %v3744_v45 }
 0x1c0   : > { %2420 = vrsqrt.f32 %v1006_v0  ;;  %v1241_v19 = vadd.f32 %v3245_v44, %v1170_v34  ;;  %v1101_v21 = vmul.f32 %v2411_v3, %v3745_v57  ;;  %v3746_v44 = vld [vmem:[#allocation11_spill] sm:$0xff] }
 0x1c1   : > { %2244 = vmatmul.mubr.msk.f32.gmra.mrb[26].mxu1 %vm301_vm0, %v1272_v7  ;;  %v1202_v42 = vmul.f32 %v2422_v60, %v1132_v47 }
 0x1c2   : > { %v2413_v46 = vpop.eup %2412  ;;  %2198 = vmatprep.mubr.msk.f32.mxu0 %vm301_vm0, %v1241_v19  ;;  %v1171_v10 = vmul.f32 %v2422_v60, %v1101_v21 }
 0x1c3   : > { %v2415_v39 = vpop.eup %2414  ;;  %v1273_v23 = vadd.f32 %v2423_v5, %v1202_v42  ;;  %v1133_v33 = vmul.f32 %v2413_v46, %v3746_v44 }
 0x1c4   : > { %v1242_v20 = vadd.f32 %v2423_v5, %v1171_v10  ;;  %v1102_v50 = vmul.f32 %v2415_v39, %v3747_v13 }
 0x1c5   : > { %2246 = vmatprep.mubr.msk.f32.mxu1 %vm301_vm0, %v1273_v23  ;;  %v1203_v36 = vmul.f32 %v2422_v60, %v1133_v33 }
 0x1c6   : > { %v2417_v27 = vpop.eup %2416  ;;  %2199 = vmatmul.mubr.msk.f32.gmra.mrb[28].mxu0 %vm301_vm0, %v1242_v20  ;;  %v1172_v52 = vmul.f32 %v2422_v60, %v1102_v50 }
 0x1c7   : > { %v2419_v22 = vpop.eup %2418  ;;  %v1274_v30 = vadd.f32 %v2423_v5, %v1203_v36  ;;  %v1134_v62 = vmul.f32 %v2417_v27, %v3748_v61 }
 0x1c8   : > { %v1243_v41 = vadd.f32 %v2423_v5, %v1172_v52  ;;  %v1103_v12 = vmul.f32 %v2419_v22, %v3749_v32 }
 0x1c9   : > { %2247 = vmatmul.mubr.msk.f32.gmra.mrb[28].mxu1 %vm301_vm0, %v1274_v30  ;;  %v1204_v31 = vmul.f32 %v2422_v60, %v1134_v62 }
 0x1ca   : > { %v2421_v26 = vpop.eup %2420  ;;  %2201 = vmatprep.mubr.msk.f32.mxu0 %vm301_vm0, %v1243_v41  ;;  %v1173_v54 = vmul.f32 %v2422_v60, %v1103_v12 }
 0x1cb   : > { %v1275_v25 = vadd.f32 %v2423_v5, %v1204_v31  ;;  %v1135_v35 = vmul.f32 %v2421_v26, %v3750_v48 }
 0x1cc   : > { %v1244_v49 = vadd.f32 %v2423_v5, %v1173_v54 }
 0x1cd   : > { %2249 = vmatprep.mubr.msk.f32.mxu1 %vm301_vm0, %v1275_v25  ;;  %v1205_v56 = vmul.f32 %v2422_v60, %v1135_v35 }
 0x1ce   : > { %2202 = vmatmul.mubr.msk.f32.gmra.mrb[30].mxu0 %vm301_vm0, %v1244_v49 }
 0x1cf   : > { %v1276_v18 = vadd.f32 %v2423_v5, %v1205_v56 }
 0x1d1   : > { %2250 = vmatmul.mubr.msk.f32.gmra.mrb[30].mxu1 %vm301_vm0, %v1276_v18 }
 0x229   : > { %v2158_v55 = vpop.f32.mrb[0].mxu0 }
 0x22a   : > { %1857 = vst.msk [vmem:[%s3499_s15 + $0x8] sm:$0xff] %vm1855_vm1, %v2158_v55  ;;  %v1536_v4 = vpop.f32.mrb[1].mxu0 }
 0x22b   : > { %1856 = vst.msk [vmem:[%s3499_s15] sm:$0xff] %vm1855_vm1, %v1536_v4 }
 0x22c   : > { %v2206_v43 = vpop.f32.mrb[0].mxu1 }
 0x22d   : > { %1889 = vst.msk [vmem:[%s3499_s15 + $0x108] sm:$0xff] %vm1855_vm1, %v2206_v43  ;;  %v1696_v15 = vpop.f32.mrb[1].mxu1 }
 0x22e   : > { %1888 = vst.msk [vmem:[%s3499_s15 + $0x100] sm:$0xff] %vm1855_vm1, %v1696_v15 }
 0x231   : > { %v2161_v14 = vpop.f32.mrb[2].mxu0 }
 0x232   : > { %1859 = vst.msk [vmem:[%s3499_s15 + $0x18] sm:$0xff] %vm1855_vm1, %v2161_v14  ;;  %v1546_v38 = vpop.f32.mrb[3].mxu0 }
 0x233   : > { %1858 = vst.msk [vmem:[%s3499_s15 + $0x10] sm:$0xff] %vm1855_vm1, %v1546_v38 }
 0x234   : > { %v2209_v28 = vpop.f32.mrb[2].mxu1 }
 0x235   : > { %1891 = vst.msk [vmem:[%s3499_s15 + $0x118] sm:$0xff] %vm1855_vm1, %v2209_v28  ;;  %v1706_v17 = vpop.f32.mrb[3].mxu1 }
 0x236   : > { %1890 = vst.msk [vmem:[%s3499_s15 + $0x110] sm:$0xff] %vm1855_vm1, %v1706_v17 }
 0x239   : > { %v2164_v37 = vpop.f32.mrb[4].mxu0 }
 0x23a   : > { %1861 = vst.msk [vmem:[%s3499_s15 + $0x28] sm:$0xff] %vm1855_vm1, %v2164_v37  ;;  %v1556_v58 = vpop.f32.mrb[5].mxu0 }
 0x23b   : > { %1860 = vst.msk [vmem:[%s3499_s15 + $0x20] sm:$0xff] %vm1855_vm1, %v1556_v58 }
 0x23c   : > { %v2212_v9 = vpop.f32.mrb[4].mxu1 }
 0x23d   : > { %1893 = vst.msk [vmem:[%s3499_s15 + $0x128] sm:$0xff] %vm1855_vm1, %v2212_v9  ;;  %v1716_v51 = vpop.f32.mrb[5].mxu1 }
 0x23e   : > { %1892 = vst.msk [vmem:[%s3499_s15 + $0x120] sm:$0xff] %vm1855_vm1, %v1716_v51 }
 0x241   : > { %v2167_v59 = vpop.f32.mrb[6].mxu0 }
 0x242   : > { %1863 = vst.msk [vmem:[%s3499_s15 + $0x38] sm:$0xff] %vm1855_vm1, %v2167_v59  ;;  %v1566_v6 = vpop.f32.mrb[7].mxu0 }
 0x243   : > { %1862 = vst.msk [vmem:[%s3499_s15 + $0x30] sm:$0xff] %vm1855_vm1, %v1566_v6 }
 0x244   : > { %v2215_v53 = vpop.f32.mrb[6].mxu1 }
 0x245   : > { %1895 = vst.msk [vmem:[%s3499_s15 + $0x138] sm:$0xff] %vm1855_vm1, %v2215_v53  ;;  %v1726_v63 = vpop.f32.mrb[7].mxu1 }
 0x246   : > { %1894 = vst.msk [vmem:[%s3499_s15 + $0x130] sm:$0xff] %vm1855_vm1, %v1726_v63 }
 0x249   : > { %v2170_v11 = vpop.f32.mrb[8].mxu0 }
 0x24a   : > { %1865 = vst.msk [vmem:[%s3499_s15 + $0x48] sm:$0xff] %vm1855_vm1, %v2170_v11  ;;  %v1576_v29 = vpop.f32.mrb[9].mxu0 }
 0x24b   : > { %1864 = vst.msk [vmem:[%s3499_s15 + $0x40] sm:$0xff] %vm1855_vm1, %v1576_v29 }
 0x24c   : > { %v2218_v1 = vpop.f32.mrb[8].mxu1 }
 0x24d   : > { %1897 = vst.msk [vmem:[%s3499_s15 + $0x148] sm:$0xff] %vm1855_vm1, %v2218_v1  ;;  %v1736_v40 = vpop.f32.mrb[9].mxu1 }
 0x24e   : > { %1896 = vst.msk [vmem:[%s3499_s15 + $0x140] sm:$0xff] %vm1855_vm1, %v1736_v40 }
 0x251   : > { %v2173_v2 = vpop.f32.mrb[10].mxu0 }
 0x252   : > { %1867 = vst.msk [vmem:[%s3499_s15 + $0x58] sm:$0xff] %vm1855_vm1, %v2173_v2  ;;  %v1586_v24 = vpop.f32.mrb[11].mxu0 }
 0x253   : > { %1866 = vst.msk [vmem:[%s3499_s15 + $0x50] sm:$0xff] %vm1855_vm1, %v1586_v24 }
 0x254   : > { %v2221_v16 = vpop.f32.mrb[10].mxu1 }
 0x255   : > { %1899 = vst.msk [vmem:[%s3499_s15 + $0x158] sm:$0xff] %vm1855_vm1, %v2221_v16  ;;  %v1746_v8 = vpop.f32.mrb[11].mxu1 }
 0x256   : > { %1898 = vst.msk [vmem:[%s3499_s15 + $0x150] sm:$0xff] %vm1855_vm1, %v1746_v8 }
 0x259   : > { %v2176_v0 = vpop.f32.mrb[12].mxu0 }
 0x25a   : > { %1869 = vst.msk [vmem:[%s3499_s15 + $0x68] sm:$0xff] %vm1855_vm1, %v2176_v0  ;;  %v1596_v34 = vpop.f32.mrb[13].mxu0 }
 0x25b   : > { %1868 = vst.msk [vmem:[%s3499_s15 + $0x60] sm:$0xff] %vm1855_vm1, %v1596_v34 }
 0x25c   : > { %v2224_v3 = vpop.f32.mrb[12].mxu1 }
 0x25d   : > { %1901 = vst.msk [vmem:[%s3499_s15 + $0x168] sm:$0xff] %vm1855_vm1, %v2224_v3  ;;  %v1756_v7 = vpop.f32.mrb[13].mxu1 }
 0x25e   : > { %1900 = vst.msk [vmem:[%s3499_s15 + $0x160] sm:$0xff] %vm1855_vm1, %v1756_v7 }
 0x261   : > { %v2179_v45 = vpop.f32.mrb[14].mxu0 }
 0x262   : > { %1871 = vst.msk [vmem:[%s3499_s15 + $0x78] sm:$0xff] %vm1855_vm1, %v2179_v45  ;;  %v1606_v47 = vpop.f32.mrb[15].mxu0 }
 0x263   : > { %1870 = vst.msk [vmem:[%s3499_s15 + $0x70] sm:$0xff] %vm1855_vm1, %v1606_v47 }
 0x264   : > { %v2227_v19 = vpop.f32.mrb[14].mxu1 }
 0x265   : > { %1903 = vst.msk [vmem:[%s3499_s15 + $0x178] sm:$0xff] %vm1855_vm1, %v2227_v19  ;;  %v1766_v57 = vpop.f32.mrb[15].mxu1 }
 0x266   : > { %1902 = vst.msk [vmem:[%s3499_s15 + $0x170] sm:$0xff] %vm1855_vm1, %v1766_v57 }
 0x269   : > { %v2182_v21 = vpop.f32.mrb[16].mxu0 }
 0x26a   : > { %1873 = vst.msk [vmem:[%s3499_s15 + $0x88] sm:$0xff] %vm1855_vm1, %v2182_v21  ;;  %v1616_v60 = vpop.f32.mrb[17].mxu0 }
 0x26b   : > { %1872 = vst.msk [vmem:[%s3499_s15 + $0x80] sm:$0xff] %vm1855_vm1, %v1616_v60 }
 0x26c   : > { %v2230_v42 = vpop.f32.mrb[16].mxu1 }
 0x26d   : > { %1905 = vst.msk [vmem:[%s3499_s15 + $0x188] sm:$0xff] %vm1855_vm1, %v2230_v42  ;;  %v1776_v46 = vpop.f32.mrb[17].mxu1 }
 0x26e   : > { %1904 = vst.msk [vmem:[%s3499_s15 + $0x180] sm:$0xff] %vm1855_vm1, %v1776_v46 }
 0x271   : > { %v2185_v10 = vpop.f32.mrb[18].mxu0 }
 0x272   : > { %1875 = vst.msk [vmem:[%s3499_s15 + $0x98] sm:$0xff] %vm1855_vm1, %v2185_v10  ;;  %v1626_v39 = vpop.f32.mrb[19].mxu0 }
 0x273   : > { %1874 = vst.msk [vmem:[%s3499_s15 + $0x90] sm:$0xff] %vm1855_vm1, %v1626_v39 }
 0x274   : > { %v2233_v5 = vpop.f32.mrb[18].mxu1 }
 0x275   : > { %1907 = vst.msk [vmem:[%s3499_s15 + $0x198] sm:$0xff] %vm1855_vm1, %v2233_v5  ;;  %v1786_v23 = vpop.f32.mrb[19].mxu1 }
 0x276   : > { %1906 = vst.msk [vmem:[%s3499_s15 + $0x190] sm:$0xff] %vm1855_vm1, %v1786_v23 }
 0x279   : > { %v2188_v44 = vpop.f32.mrb[20].mxu0 }
 0x27a   : > { %1877 = vst.msk [vmem:[%s3499_s15 + $0xa8] sm:$0xff] %vm1855_vm1, %v2188_v44  ;;  %v1636_v33 = vpop.f32.mrb[21].mxu0 }
 0x27b   : > { %1876 = vst.msk [vmem:[%s3499_s15 + $0xa0] sm:$0xff] %vm1855_vm1, %v1636_v33 }
 0x27c   : > { %v2236_v20 = vpop.f32.mrb[20].mxu1 }
 0x27d   : > { %1909 = vst.msk [vmem:[%s3499_s15 + $0x1a8] sm:$0xff] %vm1855_vm1, %v2236_v20  ;;  %v1796_v13 = vpop.f32.mrb[21].mxu1 }
 0x27e   : > { %1908 = vst.msk [vmem:[%s3499_s15 + $0x1a0] sm:$0xff] %vm1855_vm1, %v1796_v13 }
 0x281   : > { %v2191_v50 = vpop.f32.mrb[22].mxu0 }
 0x282   : > { %1879 = vst.msk [vmem:[%s3499_s15 + $0xb8] sm:$0xff] %vm1855_vm1, %v2191_v50  ;;  %v1646_v36 = vpop.f32.mrb[23].mxu0 }
 0x283   : > { %1878 = vst.msk [vmem:[%s3499_s15 + $0xb0] sm:$0xff] %vm1855_vm1, %v1646_v36 }
 0x284   : > { %v2239_v27 = vpop.f32.mrb[22].mxu1 }
 0x285   : > { %1911 = vst.msk [vmem:[%s3499_s15 + $0x1b8] sm:$0xff] %vm1855_vm1, %v2239_v27  ;;  %v1806_v52 = vpop.f32.mrb[23].mxu1 }
 0x286   : > { %1910 = vst.msk [vmem:[%s3499_s15 + $0x1b0] sm:$0xff] %vm1855_vm1, %v1806_v52 }
 0x289   : > { %v2194_v22 = vpop.f32.mrb[24].mxu0 }
 0x28a   : > { %1881 = vst.msk [vmem:[%s3499_s15 + $0xc8] sm:$0xff] %vm1855_vm1, %v2194_v22  ;;  %v1656_v30 = vpop.f32.mrb[25].mxu0 }
 0x28b   : > { %1880 = vst.msk [vmem:[%s3499_s15 + $0xc0] sm:$0xff] %vm1855_vm1, %v1656_v30 }
 0x28c   : > { %v2242_v61 = vpop.f32.mrb[24].mxu1 }
 0x28d   : > { %1913 = vst.msk [vmem:[%s3499_s15 + $0x1c8] sm:$0xff] %vm1855_vm1, %v2242_v61  ;;  %v1816_v62 = vpop.f32.mrb[25].mxu1 }
 0x28e   : > { %1912 = vst.msk [vmem:[%s3499_s15 + $0x1c0] sm:$0xff] %vm1855_vm1, %v1816_v62 }
 0x291   : > { %v2197_v41 = vpop.f32.mrb[26].mxu0 }
 0x292   : > { %1883 = vst.msk [vmem:[%s3499_s15 + $0xd8] sm:$0xff] %vm1855_vm1, %v2197_v41  ;;  %v1666_v32 = vpop.f32.mrb[27].mxu0 }
 0x293   : > { %1882 = vst.msk [vmem:[%s3499_s15 + $0xd0] sm:$0xff] %vm1855_vm1, %v1666_v32 }
 0x294   : > { %v2245_v12 = vpop.f32.mrb[26].mxu1 }
 0x295   : > { %1915 = vst.msk [vmem:[%s3499_s15 + $0x1d8] sm:$0xff] %vm1855_vm1, %v2245_v12  ;;  %v1826_v31 = vpop.f32.mrb[27].mxu1 }
 0x296   : > { %1914 = vst.msk [vmem:[%s3499_s15 + $0x1d0] sm:$0xff] %vm1855_vm1, %v1826_v31 }
 0x299   : > { %v2200_v26 = vpop.f32.mrb[28].mxu0 }
 0x29a   : > { %1885 = vst.msk [vmem:[%s3499_s15 + $0xe8] sm:$0xff] %vm1855_vm1, %v2200_v26  ;;  %v1676_v54 = vpop.f32.mrb[29].mxu0 }
 0x29b   : > { %1884 = vst.msk [vmem:[%s3499_s15 + $0xe0] sm:$0xff] %vm1855_vm1, %v1676_v54 }
 0x29c   : > { %v2248_v25 = vpop.f32.mrb[28].mxu1 }
 0x29d   : > { %1917 = vst.msk [vmem:[%s3499_s15 + $0x1e8] sm:$0xff] %vm1855_vm1, %v2248_v25  ;;  %v1836_v48 = vpop.f32.mrb[29].mxu1 }
 0x29e   : > { %1916 = vst.msk [vmem:[%s3499_s15 + $0x1e0] sm:$0xff] %vm1855_vm1, %v1836_v48 }
 0x2a1   : > { %v2203_v35 = vpop.f32.mrb[30].mxu0 }
 0x2a2   : > { %1887 = vst.msk [vmem:[%s3499_s15 + $0xf8] sm:$0xff] %vm1855_vm1, %v2203_v35  ;;  %v1686_v49 = vpop.f32.mrb[31].mxu0 }
 0x2a3   : > { %1886 = vst.msk [vmem:[%s3499_s15 + $0xf0] sm:$0xff] %vm1855_vm1, %v1686_v49 }
 0x2a4   : > { %v2251_v56 = vpop.f32.mrb[30].mxu1 }
 0x2a5   : > { %1919 = vst.msk [vmem:[%s3499_s15 + $0x1f8] sm:$0xff] %vm1855_vm1, %v2251_v56  ;;  %v1846_v18 = vpop.f32.mrb[31].mxu1 }
 0x2a6   : > { %1918 = vst.msk [vmem:[%s3499_s15 + $0x1f0] sm:$0xff] %vm1855_vm1, %v1846_v18 }
 0x2a7 PF: > { %s14_s19 = sadd.s32 1, %s2462_s19   ;;  %s3751_s15 = smov %s2454_s17 }
 0x2a8   : > { %p11_p7 = scmp.ge.s32.totalorder %s14_s19, 6   ;;  %s3752_s16 = smov %s2458_s18 }
 0x2a9   : > { %s3753_s17 = smov %s3756_s20  ;;  %s3754_s18 = smov %s3760_s21 }
 0x2aa   :  { %13 = sbr.rel (!%p11_p7) target bundleno = 3 (0x3), region = 66 }

</bundles_post_ra>
